<compile_context>
chip_gen: v7x
topology: tpu7x:2x2x1
jax: 0.10.0
libtpu: 0.0.40
codegen_flags: <defaults>
</compile_context>

<pallas_src>
import functools

import jax
import jax.numpy as jnp
from jax.experimental import pallas as pl
from jax.experimental.pallas import tpu as pltpu


# --------------------------------------------------------------------------
# Pass 1: LayerNorm + head-major Q/K/V projection (each row touched once).
# --------------------------------------------------------------------------
def _ln_qkv_proj_kernel(x_ref, gamma_ref, beta_ref,
                        wq_ref, bq_ref, wk_ref, bk_ref, wv_ref, bv_ref,
                        q_out_ref, k_out_ref, v_out_ref, *, heads, eps):
  x = x_ref[0].astype(jnp.float32)                       # (ts, D)
  mean = jnp.mean(x, axis=-1, keepdims=True)
  var = jnp.mean((x - mean) ** 2, axis=-1, keepdims=True)
  xn = (x - mean) * jax.lax.rsqrt(var + eps) * gamma_ref[...] + beta_ref[...]
  xn = xn.astype(jnp.bfloat16)                           # MXU operand

  # Per-head (heads is small & static): leading-axis indexing of head-major
  # weights / outputs, so no sub-128 lane slicing anywhere.
  for h in range(heads):
    q = jnp.dot(xn, wq_ref[h], preferred_element_type=jnp.float32) + bq_ref[h]
    k = jnp.dot(xn, wk_ref[h], preferred_element_type=jnp.float32) + bk_ref[h]
    v = jnp.dot(xn, wv_ref[h], preferred_element_type=jnp.float32) + bv_ref[h]
    q_out_ref[0, h] = q.astype(q_out_ref.dtype)          # Wq/bq pre-scaled by 1/sqrt(hd)
    k_out_ref[0, h] = k.astype(k_out_ref.dtype)
    v_out_ref[0, h] = v.astype(v_out_ref.dtype)


# --------------------------------------------------------------------------
# Pass 2: flash attention over projected K/V tiles + fused output projection.
# --------------------------------------------------------------------------
def _flash_attn_kernel(q_ref, k_ref, v_ref, wp_ref, bp_ref, o_ref,
                       m_scr, l_scr, acc_scr, *, heads):
  ki = pl.program_id(2)
  nk = pl.num_programs(2)

  @pl.when(ki == 0)
  def _init():
    m_scr[...] = jnp.full_like(m_scr, -jnp.inf)
    l_scr[...] = jnp.zeros_like(l_scr)
    acc_scr[...] = jnp.zeros_like(acc_scr)

  q = q_ref[0]                                           # (H, tq, qk_hd) bf16 (pre-scaled)
  k = k_ref[0]                                           # (H, tk, qk_hd) bf16
  v = v_ref[0]                                           # (H, tk, v_hd)  bf16

  # Head-batched QK^T: contract last dims, batch over heads (no kh.T, no per-head loop).
  s = jax.lax.dot_general(q, k, (((2,), (2,)), ((0,), (0,))),
                          preferred_element_type=jnp.float32)   # (H, tq, tk)

  m_prev = m_scr[...]                                    # (H, tq, 1)
  m_new = jnp.maximum(m_prev, jnp.max(s, axis=-1, keepdims=True))
  alpha = jnp.exp(m_prev - m_new)                        # (H, tq, 1)
  p = jnp.exp(s - m_new)                                 # (H, tq, tk)
  # NOTE: if bundle dumps show this XLU row-sum is the binding slot, fold it
  # into the MXU (p @ ones / ones-column appended to V).
  l_scr[...] = alpha * l_scr[...] + jnp.sum(p, axis=-1, keepdims=True)
  m_scr[...] = m_new

  pv = jax.lax.dot_general(p.astype(jnp.bfloat16), v, (((2,), (1,)), ((0,), (0,))),
                           preferred_element_type=jnp.float32)  # (H, tq, v_hd)
  acc_scr[...] = alpha * acc_scr[...] + pv

  @pl.when(ki == nk - 1)
  def _finalize():
    inv_l = pl.reciprocal(l_scr[...], approx=True)       # EUP, not VPU divide
    attn = (acc_scr[...] * inv_l).astype(jnp.bfloat16)   # (H, tq, v_hd)
    # Output projection with head-major Wp (H, v_hd, out_dim): per-head matmul
    # accumulated in f32 == concat_heads(attn) @ Wp, without any relayout.
    out = jnp.dot(attn[0], wp_ref[0], preferred_element_type=jnp.float32)
    for h in range(1, heads):
      out = out + jnp.dot(attn[h], wp_ref[h], preferred_element_type=jnp.float32)
    out = out + bp_ref[...]
    o_ref[0] = out.astype(o_ref.dtype)


# --------------------------------------------------------------------------
# Host-side helpers.
# --------------------------------------------------------------------------
def _pick_tile(s, target):
  """Largest tile <= target dividing s; prefer multiples of 128 (full lanes),
  then 16 (packed bf16 sublanes), then 8; else the full extent."""
  if s <= target:
    return s
  for mult in (128, 16, 8):
    t = (target // mult) * mult
    while t >= mult:
      if s % t == 0:
        return t
      t -= mult
  return s


def _device_tuning():
  """(vmem_limit_bytes, tile_target) per TPU generation (safe defaults)."""
  try:
    kind = jax.devices()[0].device_kind.lower()
  except Exception:  # pragma: no cover - defensive
    kind = ""
  if "v5" in kind or "v6" in kind:
    # 128 MiB physical VMEM: bigger tiles + higher scoped limit pay off.
    return 96 * 1024 * 1024, 512
  # v7x (64 MiB/TC) or unknown: stay conservative.
  return 48 * 1024 * 1024, 256


def _const_spec(shape, index_map, single_buffer):
  """Constant-index weight block; single-buffered when supported."""
  if single_buffer:
    return pl.BlockSpec(shape, index_map, pipeline_mode=pl.Buffered(1))
  return pl.BlockSpec(shape, index_map)


def _forward(x, gamma, beta, wq3, bq3, wk3, bk3, wv3, bv3, wp3, bp,
             *, heads, eps, ts, tq, tk, vmem_limit, single_buffer):
  B, S, D = x.shape
  qk_hd = wq3.shape[-1]
  v_hd = wv3.shape[-1]
  out_dim = wp3.shape[-1]

  # ---- Pass 1: LN + head-major Q/K/V projection --------------------------
  proj_kernel = functools.partial(_ln_qkv_proj_kernel, heads=heads, eps=eps)
  c1 = lambda shape: _const_spec(shape, lambda b, si: (0,) * len(shape), single_buffer)

  q_p, k_p, v_p = pl.pallas_call(
      proj_kernel,
      out_shape=(jax.ShapeDtypeStruct((B, heads, S, qk_hd), jnp.bfloat16),
                 jax.ShapeDtypeStruct((B, heads, S, qk_hd), jnp.bfloat16),
                 jax.ShapeDtypeStruct((B, heads, S, v_hd), jnp.bfloat16)),
      grid_spec=pltpu.PrefetchScalarGridSpec(
          num_scalar_prefetch=0,
          grid=(B, S // ts),
          in_specs=[
              pl.BlockSpec((1, ts, D), lambda b, si: (b, si, 0)),       # x rows
              c1((1, D)), c1((1, D)),                                   # gamma, beta
              c1((heads, D, qk_hd)), c1((heads, 1, qk_hd)),             # Wq, bq (pre-scaled)
              c1((heads, D, qk_hd)), c1((heads, 1, qk_hd)),             # Wk, bk
              c1((heads, D, v_hd)), c1((heads, 1, v_hd)),               # Wv, bv
          ],
          out_specs=[
              pl.BlockSpec((1, heads, ts, qk_hd), lambda b, si: (b, 0, si, 0)),
              pl.BlockSpec((1, heads, ts, qk_hd), lambda b, si: (b, 0, si, 0)),
              pl.BlockSpec((1, heads, ts, v_hd), lambda b, si: (b, 0, si, 0)),
          ]),
      compiler_params=pltpu.CompilerParams(
          dimension_semantics=("parallel", "parallel"),
          vmem_limit_bytes=vmem_limit),
  )(x, gamma, beta, wq3, bq3, wk3, bk3, wv3, bv3)

  # ---- Pass 2: flash attention + output projection ------------------------
  attn_kernel = functools.partial(_flash_attn_kernel, heads=heads)
  c2 = lambda shape: _const_spec(shape, lambda b, qi, ki: (0,) * len(shape), single_buffer)

  return pl.pallas_call(
      attn_kernel,
      out_shape=jax.ShapeDtypeStruct((B, S, out_dim), x.dtype),
      grid_spec=pltpu.PrefetchScalarGridSpec(
          num_scalar_prefetch=0,
          grid=(B, S // tq, S // tk),
          in_specs=[
              pl.BlockSpec((1, heads, tq, qk_hd), lambda b, qi, ki: (b, 0, qi, 0)),
              pl.BlockSpec((1, heads, tk, qk_hd), lambda b, qi, ki: (b, 0, ki, 0)),
              pl.BlockSpec((1, heads, tk, v_hd), lambda b, qi, ki: (b, 0, ki, 0)),
              c2((heads, v_hd, out_dim)),                               # Wp (head-major)
              c2((1, out_dim)),                                         # bp
          ],
          out_specs=pl.BlockSpec((1, tq, out_dim), lambda b, qi, ki: (b, qi, 0)),
          scratch_shapes=[
              pltpu.VMEM((heads, tq, 1), jnp.float32),    # running max (head-major)
              pltpu.VMEM((heads, tq, 1), jnp.float32),    # running denom
              pltpu.VMEM((heads, tq, v_hd), jnp.float32), # output accumulator
          ]),
      compiler_params=pltpu.CompilerParams(
          dimension_semantics=("parallel", "parallel", "arbitrary"),
          vmem_limit_bytes=vmem_limit),
  )(q_p, k_p, v_p, wp3, bp)


def self_attention(x, params, *, heads, eps=1e-5, ts=None, tq=None, tk=None):
  """Flash-style SelfAttention forward. x: (B, S, D); params: see init_params."""
  B, S, D = x.shape
  qk_out = params["wq"].shape[1]
  v_out = params["wv"].shape[1]
  assert qk_out % heads == 0 and v_out % heads == 0
  qk_hd = qk_out // heads
  v_hd = v_out // heads
  out_dim = params["wp"].shape[1]

  vmem_limit, tile_target = _device_tuning()
  ts = _pick_tile(S, tile_target) if ts is None else ts
  tq = _pick_tile(S, tile_target) if tq is None else tq
  tk = _pick_tile(S, tile_target) if tk is None else tk
  assert S % ts == 0 and S % tq == 0 and S % tk == 0
  # TODO(synk): ragged S (not divisible by tile) and attention_mask are not handled;
  # any mask added later must zero exp(s) before the row-sum of the online softmax.

  # Host-side prep: fold softmax scale into Wq/bq, reshape all projection
  # weights head-major (heads on the leading axis), bf16 MXU operands.
  f32, bf16 = jnp.float32, jnp.bfloat16
  scale = 1.0 / (qk_hd ** 0.5)
  wq3 = (params["wq"] * scale).reshape(D, heads, qk_hd).transpose(1, 0, 2).astype(bf16)
  bq3 = (params["bq"][0] * scale).reshape(heads, 1, qk_hd).astype(f32)
  wk3 = params["wk"].reshape(D, heads, qk_hd).transpose(1, 0, 2).astype(bf16)
  bk3 = params["bk"][0].reshape(heads, 1, qk_hd).astype(f32)
  wv3 = params["wv"].reshape(D, heads, v_hd).transpose(1, 0, 2).astype(bf16)
  bv3 = params["bv"][0].reshape(heads, 1, v_hd).astype(f32)
  wp3 = params["wp"].reshape(heads, v_hd, out_dim).astype(bf16)
  bp = params["bp"].astype(f32)
  gamma = params["gamma"].astype(f32)
  beta = params["beta"].astype(f32)

  kwargs = dict(heads=heads, eps=eps, ts=ts, tq=tq, tk=tk, vmem_limit=vmem_limit)
  try:
    return _forward(x, gamma, beta, wq3, bq3, wk3, bk3, wv3, bv3, wp3, bp,
                    single_buffer=True, **kwargs)
  except Exception:
    # pl.Buffered(1) not supported by this JAX/Mosaic build: fall back to the
    # default double-buffered weight blocks (correctness unaffected).
    return _forward(x, gamma, beta, wq3, bq3, wk3, bk3, wv3, bv3, wp3, bp,
                    single_buffer=False, **kwargs)


# --------------------------------------------------------------------------
# Parameters / reference.
# --------------------------------------------------------------------------
def init_params(key, q_dim, qk_out_dim, v_out_dim, out_dim):
  """Deterministic synthetic parameters. Linear weights stored as (in, out)."""
  ks = jax.random.split(key, 8)

  def lin(k, din, dout):
    bound = 1.0 / (din ** 0.5)
    kw, kb = jax.random.split(k)
    w = jax.random.uniform(kw, (din, dout), jnp.float32, -bound, bound)
    b = jax.random.uniform(kb, (1, dout), jnp.float32, -bound, bound)
    return w, b

  wq, bq = lin(ks[0], q_dim, qk_out_dim)
  wk, bk = lin(ks[1], q_dim, qk_out_dim)
  wv, bv = lin(ks[2], q_dim, v_out_dim)
  wp, bp = lin(ks[3], v_out_dim, out_dim)
  gamma = jnp.ones((1, q_dim), jnp.float32)
  beta = jnp.zeros((1, q_dim), jnp.float32)
  return dict(gamma=gamma, beta=beta, wq=wq, bq=bq, wk=wk, bk=bk,
              wv=wv, bv=bv, wp=wp, bp=bp)


def reference(x, params, *, heads, eps=1e-5):
  """Pure-JAX reference mirroring the PyTorch forward (dropout=0, mask=None)."""
  mean = jnp.mean(x, axis=-1, keepdims=True)
  var = jnp.mean((x - mean) ** 2, axis=-1, keepdims=True)
  xn = (x - mean) / jnp.sqrt(var + eps) * params["gamma"][0] + params["beta"][0]

  B, S, D = x.shape
  q = xn @ params["wq"] + params["bq"][0]
  k = xn @ params["wk"] + params["bk"][0]
  v = xn @ params["wv"] + params["bv"][0]
  qk_hd = q.shape[-1] // heads
  v_hd = v.shape[-1] // heads
  q = q.reshape(B, S, heads, qk_hd)
  k = k.reshape(B, S, heads, qk_hd)
  v = v.reshape(B, S, heads, v_hd)
  energy = jnp.einsum("nqhd,nkhd->nhqk", q, k)
  attn = jax.nn.softmax(energy / (qk_hd ** 0.5), axis=3)
  out = jnp.einsum("nhql,nlhd->nqhd", attn, v).reshape(B, S, heads * v_hd)
  return out @ params["wp"] + params["bp"][0]


if __name__ == "__main__":
  B, S, D = 2, 8, 32
  HEADS = 2
  qk_out_dim, v_out_dim, out_dim = D, D, D   # SelfAttention: output_dim = q_dim

  key = jax.random.PRNGKey(0)
  kx, kp = jax.random.split(key)
  x = jax.random.normal(kx, (B, S, D), jnp.float32)
  params = init_params(kp, D, qk_out_dim, v_out_dim, out_dim)

  out = self_attention(x, params, heads=HEADS)
  out = jax.block_until_ready(out)

  ref = reference(x, params, heads=HEADS)
  assert out.shape == (B, S, out_dim)
  # bf16 MXU operands (f32 accumulation) + approx reciprocal => relaxed but
  # meaningfully tighter tolerance than before (flags real bugs at these dims).
  assert jnp.allclose(out, ref, atol=5e-2, rtol=5e-2), "mismatch vs reference"

  print("KERNEL_OK")
</pallas_src>

<mosaic_0001>
module attributes {stable_mosaic.version = 11 : i64} {
  func.func @_ln_qkv_proj_kernel(%arg0: i32, %arg1: i32, %arg2: memref<1x8x32xf32, #tpu.memory_space<vmem>>, %arg3: memref<1x32xf32, #tpu.memory_space<vmem>>, %arg4: memref<1x32xf32, #tpu.memory_space<vmem>>, %arg5: memref<2x32x16xbf16, #tpu.memory_space<vmem>>, %arg6: memref<2x1x16xf32, #tpu.memory_space<vmem>>, %arg7: memref<2x32x16xbf16, #tpu.memory_space<vmem>>, %arg8: memref<2x1x16xf32, #tpu.memory_space<vmem>>, %arg9: memref<2x32x16xbf16, #tpu.memory_space<vmem>>, %arg10: memref<2x1x16xf32, #tpu.memory_space<vmem>>, %arg11: memref<1x2x8x16xbf16, #tpu.memory_space<vmem>>, %arg12: memref<1x2x8x16xbf16, #tpu.memory_space<vmem>>, %arg13: memref<1x2x8x16xbf16, #tpu.memory_space<vmem>>) attributes {dimension_semantics = [#tpu.dimension_semantics<parallel>, #tpu.dimension_semantics<parallel>], iteration_bounds = array<i64: 2, 1>, scalar_prefetch = 0 : i64, scratch_operands = 0 : i64, tpu.core_type = #tpu.core_type<tc>, window_params = [{transform_indices = @transform_0, window_bounds = array<i64: 1, 8, 32>}, {pipeline_mode = #tpu.pipeline_mode<synchronous>, transform_indices = @transform_1, window_bounds = array<i64: 1, 32>}, {pipeline_mode = #tpu.pipeline_mode<synchronous>, transform_indices = @transform_2, window_bounds = array<i64: 1, 32>}, {pipeline_mode = #tpu.pipeline_mode<synchronous>, transform_indices = @transform_3, window_bounds = array<i64: 2, 32, 16>}, {pipeline_mode = #tpu.pipeline_mode<synchronous>, transform_indices = @transform_4, window_bounds = array<i64: 2, 1, 16>}, {pipeline_mode = #tpu.pipeline_mode<synchronous>, transform_indices = @transform_5, window_bounds = array<i64: 2, 32, 16>}, {pipeline_mode = #tpu.pipeline_mode<synchronous>, transform_indices = @transform_6, window_bounds = array<i64: 2, 1, 16>}, {pipeline_mode = #tpu.pipeline_mode<synchronous>, transform_indices = @transform_7, window_bounds = array<i64: 2, 32, 16>}, {pipeline_mode = #tpu.pipeline_mode<synchronous>, transform_indices = @transform_8, window_bounds = array<i64: 2, 1, 16>}, {transform_indices = @transform_9, window_bounds = array<i64: 1, 2, 8, 16>}, {transform_indices = @transform_10, window_bounds = array<i64: 1, 2, 8, 16>}, {transform_indices = @transform_11, window_bounds = array<i64: 1, 2, 8, 16>}]} {
    %c0 = arith.constant 0 : index
    %c0_0 = arith.constant 0 : index
    %c0_1 = arith.constant 0 : index
    %0 = vector.load %arg2[%c0, %c0_0, %c0_1] : memref<1x8x32xf32, #tpu.memory_space<vmem>>, vector<1x8x32xf32>
    %1 = vector.shape_cast %0 : vector<1x8x32xf32> to vector<8x32xf32>
    %cst = arith.constant dense<0.000000e+00> : vector<8xf32>
    %2 = vector.multi_reduction <add>, %1, %cst [1] : vector<8x32xf32> to vector<8xf32>
    %3 = vector.shape_cast %2 : vector<8xf32> to vector<8x1xf32>
    %cst_2 = arith.constant 3.200000e+01 : f32
    %4 = vector.broadcast %cst_2 : f32 to vector<8x1xf32>
    %5 = arith.divf %3, %4 : vector<8x1xf32>
    %6 = vector.broadcast %5 : vector<8x1xf32> to vector<8x32xf32>
    %7 = arith.subf %1, %6 : vector<8x32xf32>
    %8 = arith.mulf %7, %7 : vector<8x32xf32>
    %cst_3 = arith.constant dense<0.000000e+00> : vector<8xf32>
    %9 = vector.multi_reduction <add>, %8, %cst_3 [1] : vector<8x32xf32> to vector<8xf32>
    %10 = vector.shape_cast %9 : vector<8xf32> to vector<8x1xf32>
    %cst_4 = arith.constant 3.200000e+01 : f32
    %11 = vector.broadcast %cst_4 : f32 to vector<8x1xf32>
    %12 = arith.divf %10, %11 : vector<8x1xf32>
    %13 = vector.broadcast %5 : vector<8x1xf32> to vector<8x32xf32>
    %14 = arith.subf %1, %13 : vector<8x32xf32>
    %cst_5 = arith.constant 9.99999974E-6 : f32
    %15 = vector.broadcast %cst_5 : f32 to vector<8x1xf32>
    %16 = arith.addf %12, %15 : vector<8x1xf32>
    %17 = math.rsqrt %16 : vector<8x1xf32>
    %18 = vector.broadcast %17 : vector<8x1xf32> to vector<8x32xf32>
    %19 = arith.mulf %14, %18 : vector<8x32xf32>
    %c0_6 = arith.constant 0 : index
    %c0_7 = arith.constant 0 : index
    %20 = vector.load %arg3[%c0_6, %c0_7] : memref<1x32xf32, #tpu.memory_space<vmem>>, vector<1x32xf32>
    %21 = vector.broadcast %20 : vector<1x32xf32> to vector<8x32xf32>
    %22 = arith.mulf %19, %21 : vector<8x32xf32>
    %c0_8 = arith.constant 0 : index
    %c0_9 = arith.constant 0 : index
    %23 = vector.load %arg4[%c0_8, %c0_9] : memref<1x32xf32, #tpu.memory_space<vmem>>, vector<1x32xf32>
    %24 = vector.broadcast %23 : vector<1x32xf32> to vector<8x32xf32>
    %25 = arith.addf %22, %24 : vector<8x32xf32>
    %26 = arith.truncf %25 : vector<8x32xf32> to vector<8x32xbf16>
    %c0_10 = arith.constant 0 : index
    %c0_11 = arith.constant 0 : index
    %c0_12 = arith.constant 0 : index
    %27 = vector.load %arg5[%c0_10, %c0_11, %c0_12] : memref<2x32x16xbf16, #tpu.memory_space<vmem>>, vector<1x32x16xbf16>
    %28 = vector.shape_cast %27 : vector<1x32x16xbf16> to vector<32x16xbf16>
    %cst_13 = arith.constant dense<0.000000e+00> : vector<8x16xf32>
    %29 = tpu.matmul %26, %28, %cst_13 {dimension_numbers = #tpu.dot_dimension_numbers<[1], [0], [0], [1], [0, 0, 1, 1], [], []>} : vector<8x32xbf16>, vector<32x16xbf16>, vector<8x16xf32> -> vector<8x16xf32>
    %c0_14 = arith.constant 0 : index
    %c0_15 = arith.constant 0 : index
    %c0_16 = arith.constant 0 : index
    %30 = vector.load %arg6[%c0_14, %c0_15, %c0_16] : memref<2x1x16xf32, #tpu.memory_space<vmem>>, vector<1x1x16xf32>
    %31 = vector.shape_cast %30 : vector<1x1x16xf32> to vector<1x16xf32>
    %32 = vector.broadcast %31 : vector<1x16xf32> to vector<8x16xf32>
    %33 = arith.addf %29, %32 : vector<8x16xf32>
    %c0_17 = arith.constant 0 : index
    %c0_18 = arith.constant 0 : index
    %c0_19 = arith.constant 0 : index
    %34 = vector.load %arg7[%c0_17, %c0_18, %c0_19] : memref<2x32x16xbf16, #tpu.memory_space<vmem>>, vector<1x32x16xbf16>
    %35 = vector.shape_cast %34 : vector<1x32x16xbf16> to vector<32x16xbf16>
    %cst_20 = arith.constant dense<0.000000e+00> : vector<8x16xf32>
    %36 = tpu.matmul %26, %35, %cst_20 {dimension_numbers = #tpu.dot_dimension_numbers<[1], [0], [0], [1], [0, 0, 1, 1], [], []>} : vector<8x32xbf16>, vector<32x16xbf16>, vector<8x16xf32> -> vector<8x16xf32>
    %c0_21 = arith.constant 0 : index
    %c0_22 = arith.constant 0 : index
    %c0_23 = arith.constant 0 : index
    %37 = vector.load %arg8[%c0_21, %c0_22, %c0_23] : memref<2x1x16xf32, #tpu.memory_space<vmem>>, vector<1x1x16xf32>
    %38 = vector.shape_cast %37 : vector<1x1x16xf32> to vector<1x16xf32>
    %39 = vector.broadcast %38 : vector<1x16xf32> to vector<8x16xf32>
    %40 = arith.addf %36, %39 : vector<8x16xf32>
    %c0_24 = arith.constant 0 : index
    %c0_25 = arith.constant 0 : index
    %c0_26 = arith.constant 0 : index
    %41 = vector.load %arg9[%c0_24, %c0_25, %c0_26] : memref<2x32x16xbf16, #tpu.memory_space<vmem>>, vector<1x32x16xbf16>
    %42 = vector.shape_cast %41 : vector<1x32x16xbf16> to vector<32x16xbf16>
    %cst_27 = arith.constant dense<0.000000e+00> : vector<8x16xf32>
    %43 = tpu.matmul %26, %42, %cst_27 {dimension_numbers = #tpu.dot_dimension_numbers<[1], [0], [0], [1], [0, 0, 1, 1], [], []>} : vector<8x32xbf16>, vector<32x16xbf16>, vector<8x16xf32> -> vector<8x16xf32>
    %c0_28 = arith.constant 0 : index
    %c0_29 = arith.constant 0 : index
    %c0_30 = arith.constant 0 : index
    %44 = vector.load %arg10[%c0_28, %c0_29, %c0_30] : memref<2x1x16xf32, #tpu.memory_space<vmem>>, vector<1x1x16xf32>
    %45 = vector.shape_cast %44 : vector<1x1x16xf32> to vector<1x16xf32>
    %46 = vector.broadcast %45 : vector<1x16xf32> to vector<8x16xf32>
    %47 = arith.addf %43, %46 : vector<8x16xf32>
    %48 = arith.truncf %33 : vector<8x16xf32> to vector<8x16xbf16>
    %c0_31 = arith.constant 0 : index
    %c0_32 = arith.constant 0 : index
    %c0_33 = arith.constant 0 : index
    %c0_34 = arith.constant 0 : index
    %49 = vector.load %arg11[%c0_31, %c0_32, %c0_33, %c0_34] : memref<1x2x8x16xbf16, #tpu.memory_space<vmem>>, vector<1x1x8x16xbf16>
    %50 = vector.shape_cast %49 : vector<1x1x8x16xbf16> to vector<8x16xbf16>
    %51 = vector.shape_cast %48 : vector<8x16xbf16> to vector<1x1x8x16xbf16>
    tpu.vector_store %arg11[%c0_31, %c0_32, %c0_33, %c0_34], %51 {strides = array<i32>} : memref<1x2x8x16xbf16, #tpu.memory_space<vmem>>, vector<1x1x8x16xbf16>,
    %52 = arith.truncf %40 : vector<8x16xf32> to vector<8x16xbf16>
    %c0_35 = arith.constant 0 : index
    %c0_36 = arith.constant 0 : index
    %c0_37 = arith.constant 0 : index
    %c0_38 = arith.constant 0 : index
    %53 = vector.load %arg12[%c0_35, %c0_36, %c0_37, %c0_38] : memref<1x2x8x16xbf16, #tpu.memory_space<vmem>>, vector<1x1x8x16xbf16>
    %54 = vector.shape_cast %53 : vector<1x1x8x16xbf16> to vector<8x16xbf16>
    %55 = vector.shape_cast %52 : vector<8x16xbf16> to vector<1x1x8x16xbf16>
    tpu.vector_store %arg12[%c0_35, %c0_36, %c0_37, %c0_38], %55 {strides = array<i32>} : memref<1x2x8x16xbf16, #tpu.memory_space<vmem>>, vector<1x1x8x16xbf16>,
    %56 = arith.truncf %47 : vector<8x16xf32> to vector<8x16xbf16>
    %c0_39 = arith.constant 0 : index
    %c0_40 = arith.constant 0 : index
    %c0_41 = arith.constant 0 : index
    %c0_42 = arith.constant 0 : index
    %57 = vector.load %arg13[%c0_39, %c0_40, %c0_41, %c0_42] : memref<1x2x8x16xbf16, #tpu.memory_space<vmem>>, vector<1x1x8x16xbf16>
    %58 = vector.shape_cast %57 : vector<1x1x8x16xbf16> to vector<8x16xbf16>
    %59 = vector.shape_cast %56 : vector<8x16xbf16> to vector<1x1x8x16xbf16>
    tpu.vector_store %arg13[%c0_39, %c0_40, %c0_41, %c0_42], %59 {strides = array<i32>} : memref<1x2x8x16xbf16, #tpu.memory_space<vmem>>, vector<1x1x8x16xbf16>,
    %c1 = arith.constant 1 : index
    %c0_43 = arith.constant 0 : index
    %c0_44 = arith.constant 0 : index
    %60 = vector.load %arg5[%c1, %c0_43, %c0_44] : memref<2x32x16xbf16, #tpu.memory_space<vmem>>, vector<1x32x16xbf16>
    %61 = vector.shape_cast %60 : vector<1x32x16xbf16> to vector<32x16xbf16>
    %cst_45 = arith.constant dense<0.000000e+00> : vector<8x16xf32>
    %62 = tpu.matmul %26, %61, %cst_45 {dimension_numbers = #tpu.dot_dimension_numbers<[1], [0], [0], [1], [0, 0, 1, 1], [], []>} : vector<8x32xbf16>, vector<32x16xbf16>, vector<8x16xf32> -> vector<8x16xf32>
    %c1_46 = arith.constant 1 : index
    %c0_47 = arith.constant 0 : index
    %c0_48 = arith.constant 0 : index
    %63 = vector.load %arg6[%c1_46, %c0_47, %c0_48] : memref<2x1x16xf32, #tpu.memory_space<vmem>>, vector<1x1x16xf32>
    %64 = vector.shape_cast %63 : vector<1x1x16xf32> to vector<1x16xf32>
    %65 = vector.broadcast %64 : vector<1x16xf32> to vector<8x16xf32>
    %66 = arith.addf %62, %65 : vector<8x16xf32>
    %c1_49 = arith.constant 1 : index
    %c0_50 = arith.constant 0 : index
    %c0_51 = arith.constant 0 : index
    %67 = vector.load %arg7[%c1_49, %c0_50, %c0_51] : memref<2x32x16xbf16, #tpu.memory_space<vmem>>, vector<1x32x16xbf16>
    %68 = vector.shape_cast %67 : vector<1x32x16xbf16> to vector<32x16xbf16>
    %cst_52 = arith.constant dense<0.000000e+00> : vector<8x16xf32>
    %69 = tpu.matmul %26, %68, %cst_52 {dimension_numbers = #tpu.dot_dimension_numbers<[1], [0], [0], [1], [0, 0, 1, 1], [], []>} : vector<8x32xbf16>, vector<32x16xbf16>, vector<8x16xf32> -> vector<8x16xf32>
    %c1_53 = arith.constant 1 : index
    %c0_54 = arith.constant 0 : index
    %c0_55 = arith.constant 0 : index
    %70 = vector.load %arg8[%c1_53, %c0_54, %c0_55] : memref<2x1x16xf32, #tpu.memory_space<vmem>>, vector<1x1x16xf32>
    %71 = vector.shape_cast %70 : vector<1x1x16xf32> to vector<1x16xf32>
    %72 = vector.broadcast %71 : vector<1x16xf32> to vector<8x16xf32>
    %73 = arith.addf %69, %72 : vector<8x16xf32>
    %c1_56 = arith.constant 1 : index
    %c0_57 = arith.constant 0 : index
    %c0_58 = arith.constant 0 : index
    %74 = vector.load %arg9[%c1_56, %c0_57, %c0_58] : memref<2x32x16xbf16, #tpu.memory_space<vmem>>, vector<1x32x16xbf16>
    %75 = vector.shape_cast %74 : vector<1x32x16xbf16> to vector<32x16xbf16>
    %cst_59 = arith.constant dense<0.000000e+00> : vector<8x16xf32>
    %76 = tpu.matmul %26, %75, %cst_59 {dimension_numbers = #tpu.dot_dimension_numbers<[1], [0], [0], [1], [0, 0, 1, 1], [], []>} : vector<8x32xbf16>, vector<32x16xbf16>, vector<8x16xf32> -> vector<8x16xf32>
    %c1_60 = arith.constant 1 : index
    %c0_61 = arith.constant 0 : index
    %c0_62 = arith.constant 0 : index
    %77 = vector.load %arg10[%c1_60, %c0_61, %c0_62] : memref<2x1x16xf32, #tpu.memory_space<vmem>>, vector<1x1x16xf32>
    %78 = vector.shape_cast %77 : vector<1x1x16xf32> to vector<1x16xf32>
    %79 = vector.broadcast %78 : vector<1x16xf32> to vector<8x16xf32>
    %80 = arith.addf %76, %79 : vector<8x16xf32>
    %81 = arith.truncf %66 : vector<8x16xf32> to vector<8x16xbf16>
    %c0_63 = arith.constant 0 : index
    %c1_64 = arith.constant 1 : index
    %c0_65 = arith.constant 0 : index
    %c0_66 = arith.constant 0 : index
    %82 = vector.load %arg11[%c0_63, %c1_64, %c0_65, %c0_66] : memref<1x2x8x16xbf16, #tpu.memory_space<vmem>>, vector<1x1x8x16xbf16>
    %83 = vector.shape_cast %82 : vector<1x1x8x16xbf16> to vector<8x16xbf16>
    %84 = vector.shape_cast %81 : vector<8x16xbf16> to vector<1x1x8x16xbf16>
    tpu.vector_store %arg11[%c0_63, %c1_64, %c0_65, %c0_66], %84 {strides = array<i32>} : memref<1x2x8x16xbf16, #tpu.memory_space<vmem>>, vector<1x1x8x16xbf16>,
    %85 = arith.truncf %73 : vector<8x16xf32> to vector<8x16xbf16>
    %c0_67 = arith.constant 0 : index
    %c1_68 = arith.constant 1 : index
    %c0_69 = arith.constant 0 : index
    %c0_70 = arith.constant 0 : index
    %86 = vector.load %arg12[%c0_67, %c1_68, %c0_69, %c0_70] : memref<1x2x8x16xbf16, #tpu.memory_space<vmem>>, vector<1x1x8x16xbf16>
    %87 = vector.shape_cast %86 : vector<1x1x8x16xbf16> to vector<8x16xbf16>
    %88 = vector.shape_cast %85 : vector<8x16xbf16> to vector<1x1x8x16xbf16>
    tpu.vector_store %arg12[%c0_67, %c1_68, %c0_69, %c0_70], %88 {strides = array<i32>} : memref<1x2x8x16xbf16, #tpu.memory_space<vmem>>, vector<1x1x8x16xbf16>,
    %89 = arith.truncf %80 : vector<8x16xf32> to vector<8x16xbf16>
    %c0_71 = arith.constant 0 : index
    %c1_72 = arith.constant 1 : index
    %c0_73 = arith.constant 0 : index
    %c0_74 = arith.constant 0 : index
    %90 = vector.load %arg13[%c0_71, %c1_72, %c0_73, %c0_74] : memref<1x2x8x16xbf16, #tpu.memory_space<vmem>>, vector<1x1x8x16xbf16>
    %91 = vector.shape_cast %90 : vector<1x1x8x16xbf16> to vector<8x16xbf16>
    %92 = vector.shape_cast %89 : vector<8x16xbf16> to vector<1x1x8x16xbf16>
    tpu.vector_store %arg13[%c0_71, %c1_72, %c0_73, %c0_74], %92 {strides = array<i32>} : memref<1x2x8x16xbf16, #tpu.memory_space<vmem>>, vector<1x1x8x16xbf16>,
    return
  }
  func.func @transform_0(%arg0: i32, %arg1: i32) -> (i32, i32, i32) {
    %c0_i32 = arith.constant 0 : i32
    %c0_i32_0 = arith.constant 0 : i32
    return %arg0, %arg1, %c0_i32 : i32, i32, i32
  }
  func.func @transform_1(%arg0: i32, %arg1: i32) -> (i32, i32) {
    %c0_i32 = arith.constant 0 : i32
    %c0_i32_0 = arith.constant 0 : i32
    %c0_i32_1 = arith.constant 0 : i32
    return %c0_i32, %c0_i32_0 : i32, i32
  }
  func.func @transform_2(%arg0: i32, %arg1: i32) -> (i32, i32) {
    %c0_i32 = arith.constant 0 : i32
    %c0_i32_0 = arith.constant 0 : i32
    %c0_i32_1 = arith.constant 0 : i32
    return %c0_i32, %c0_i32_0 : i32, i32
  }
  func.func @transform_3(%arg0: i32, %arg1: i32) -> (i32, i32, i32) {
    %c0_i32 = arith.constant 0 : i32
    %c0_i32_0 = arith.constant 0 : i32
    %c0_i32_1 = arith.constant 0 : i32
    %c0_i32_2 = arith.constant 0 : i32
    return %c0_i32, %c0_i32_0, %c0_i32_1 : i32, i32, i32
  }
  func.func @transform_4(%arg0: i32, %arg1: i32) -> (i32, i32, i32) {
    %c0_i32 = arith.constant 0 : i32
    %c0_i32_0 = arith.constant 0 : i32
    %c0_i32_1 = arith.constant 0 : i32
    %c0_i32_2 = arith.constant 0 : i32
    return %c0_i32, %c0_i32_0, %c0_i32_1 : i32, i32, i32
  }
  func.func @transform_5(%arg0: i32, %arg1: i32) -> (i32, i32, i32) {
    %c0_i32 = arith.constant 0 : i32
    %c0_i32_0 = arith.constant 0 : i32
    %c0_i32_1 = arith.constant 0 : i32
    %c0_i32_2 = arith.constant 0 : i32
    return %c0_i32, %c0_i32_0, %c0_i32_1 : i32, i32, i32
  }
  func.func @transform_6(%arg0: i32, %arg1: i32) -> (i32, i32, i32) {
    %c0_i32 = arith.constant 0 : i32
    %c0_i32_0 = arith.constant 0 : i32
    %c0_i32_1 = arith.constant 0 : i32
    %c0_i32_2 = arith.constant 0 : i32
    return %c0_i32, %c0_i32_0, %c0_i32_1 : i32, i32, i32
  }
  func.func @transform_7(%arg0: i32, %arg1: i32) -> (i32, i32, i32) {
    %c0_i32 = arith.constant 0 : i32
    %c0_i32_0 = arith.constant 0 : i32
    %c0_i32_1 = arith.constant 0 : i32
    %c0_i32_2 = arith.constant 0 : i32
    return %c0_i32, %c0_i32_0, %c0_i32_1 : i32, i32, i32
  }
  func.func @transform_8(%arg0: i32, %arg1: i32) -> (i32, i32, i32) {
    %c0_i32 = arith.constant 0 : i32
    %c0_i32_0 = arith.constant 0 : i32
    %c0_i32_1 = arith.constant 0 : i32
    %c0_i32_2 = arith.constant 0 : i32
    return %c0_i32, %c0_i32_0, %c0_i32_1 : i32, i32, i32
  }
  func.func @transform_9(%arg0: i32, %arg1: i32) -> (i32, i32, i32, i32) {
    %c0_i32 = arith.constant 0 : i32
    %c0_i32_0 = arith.constant 0 : i32
    %c0_i32_1 = arith.constant 0 : i32
    return %arg0, %c0_i32, %arg1, %c0_i32_0 : i32, i32, i32, i32
  }
  func.func @transform_10(%arg0: i32, %arg1: i32) -> (i32, i32, i32, i32) {
    %c0_i32 = arith.constant 0 : i32
    %c0_i32_0 = arith.constant 0 : i32
    %c0_i32_1 = arith.constant 0 : i32
    return %arg0, %c0_i32, %arg1, %c0_i32_0 : i32, i32, i32, i32
  }
  func.func @transform_11(%arg0: i32, %arg1: i32) -> (i32, i32, i32, i32) {
    %c0_i32 = arith.constant 0 : i32
    %c0_i32_0 = arith.constant 0 : i32
    %c0_i32_1 = arith.constant 0 : i32
    return %arg0, %c0_i32, %arg1, %c0_i32_0 : i32, i32, i32, i32
  }
}

module attributes {stable_mosaic.version = 11 : i64} {
  func.func @_ln_qkv_proj_kernel(%arg0: i32, %arg1: i32, %arg2: memref<1x8x32xf32, #tpu.memory_space<vmem>>, %arg3: memref<1x32xf32, #tpu.memory_space<vmem>>, %arg4: memref<1x32xf32, #tpu.memory_space<vmem>>, %arg5: memref<2x32x16xbf16, #tpu.memory_space<vmem>>, %arg6: memref<2x1x16xf32, #tpu.memory_space<vmem>>, %arg7: memref<2x32x16xbf16, #tpu.memory_space<vmem>>, %arg8: memref<2x1x16xf32, #tpu.memory_space<vmem>>, %arg9: memref<2x32x16xbf16, #tpu.memory_space<vmem>>, %arg10: memref<2x1x16xf32, #tpu.memory_space<vmem>>, %arg11: memref<1x2x8x16xbf16, #tpu.memory_space<vmem>>, %arg12: memref<1x2x8x16xbf16, #tpu.memory_space<vmem>>, %arg13: memref<1x2x8x16xbf16, #tpu.memory_space<vmem>>) attributes {dimension_semantics = [#tpu.dimension_semantics<parallel>, #tpu.dimension_semantics<parallel>], iteration_bounds = array<i64: 2, 1>, scalar_prefetch = 0 : i64, scratch_operands = 0 : i64, tpu.core_type = #tpu.core_type<tc>, window_params = [{transform_indices = @transform_0, window_bounds = array<i64: 1, 8, 32>}, {pipeline_mode = #tpu.pipeline_mode<synchronous>, transform_indices = @transform_1, window_bounds = array<i64: 1, 32>}, {pipeline_mode = #tpu.pipeline_mode<synchronous>, transform_indices = @transform_2, window_bounds = array<i64: 1, 32>}, {pipeline_mode = #tpu.pipeline_mode<synchronous>, transform_indices = @transform_3, window_bounds = array<i64: 2, 32, 16>}, {pipeline_mode = #tpu.pipeline_mode<synchronous>, transform_indices = @transform_4, window_bounds = array<i64: 2, 1, 16>}, {pipeline_mode = #tpu.pipeline_mode<synchronous>, transform_indices = @transform_5, window_bounds = array<i64: 2, 32, 16>}, {pipeline_mode = #tpu.pipeline_mode<synchronous>, transform_indices = @transform_6, window_bounds = array<i64: 2, 1, 16>}, {pipeline_mode = #tpu.pipeline_mode<synchronous>, transform_indices = @transform_7, window_bounds = array<i64: 2, 32, 16>}, {pipeline_mode = #tpu.pipeline_mode<synchronous>, transform_indices = @transform_8, window_bounds = array<i64: 2, 1, 16>}, {transform_indices = @transform_9, window_bounds = array<i64: 1, 2, 8, 16>}, {transform_indices = @transform_10, window_bounds = array<i64: 1, 2, 8, 16>}, {transform_indices = @transform_11, window_bounds = array<i64: 1, 2, 8, 16>}]} {
    %c0 = arith.constant 0 : index
    %c0_0 = arith.constant 0 : index
    %c0_1 = arith.constant 0 : index
    %0 = vector.load %arg2[%c0, %c0_0, %c0_1] : memref<1x8x32xf32, #tpu.memory_space<vmem>>, vector<1x8x32xf32>
    %1 = vector.shape_cast %0 : vector<1x8x32xf32> to vector<8x32xf32>
    %cst = arith.constant dense<0.000000e+00> : vector<8xf32>
    %2 = vector.multi_reduction <add>, %1, %cst [1] : vector<8x32xf32> to vector<8xf32>
    %3 = vector.shape_cast %2 : vector<8xf32> to vector<8x1xf32>
    %cst_2 = arith.constant 3.200000e+01 : f32
    %4 = vector.broadcast %cst_2 : f32 to vector<8x1xf32>
    %5 = arith.divf %3, %4 : vector<8x1xf32>
    %6 = vector.broadcast %5 : vector<8x1xf32> to vector<8x32xf32>
    %7 = arith.subf %1, %6 : vector<8x32xf32>
    %8 = arith.mulf %7, %7 : vector<8x32xf32>
    %cst_3 = arith.constant dense<0.000000e+00> : vector<8xf32>
    %9 = vector.multi_reduction <add>, %8, %cst_3 [1] : vector<8x32xf32> to vector<8xf32>
    %10 = vector.shape_cast %9 : vector<8xf32> to vector<8x1xf32>
    %cst_4 = arith.constant 3.200000e+01 : f32
    %11 = vector.broadcast %cst_4 : f32 to vector<8x1xf32>
    %12 = arith.divf %10, %11 : vector<8x1xf32>
    %13 = vector.broadcast %5 : vector<8x1xf32> to vector<8x32xf32>
    %14 = arith.subf %1, %13 : vector<8x32xf32>
    %cst_5 = arith.constant 9.99999974E-6 : f32
    %15 = vector.broadcast %cst_5 : f32 to vector<8x1xf32>
    %16 = arith.addf %12, %15 : vector<8x1xf32>
    %17 = math.rsqrt %16 : vector<8x1xf32>
    %18 = vector.broadcast %17 : vector<8x1xf32> to vector<8x32xf32>
    %19 = arith.mulf %14, %18 : vector<8x32xf32>
    %c0_6 = arith.constant 0 : index
    %c0_7 = arith.constant 0 : index
    %20 = vector.load %arg3[%c0_6, %c0_7] : memref<1x32xf32, #tpu.memory_space<vmem>>, vector<1x32xf32>
    %21 = vector.broadcast %20 : vector<1x32xf32> to vector<8x32xf32>
    %22 = arith.mulf %19, %21 : vector<8x32xf32>
    %c0_8 = arith.constant 0 : index
    %c0_9 = arith.constant 0 : index
    %23 = vector.load %arg4[%c0_8, %c0_9] : memref<1x32xf32, #tpu.memory_space<vmem>>, vector<1x32xf32>
    %24 = vector.broadcast %23 : vector<1x32xf32> to vector<8x32xf32>
    %25 = arith.addf %22, %24 : vector<8x32xf32>
    %26 = arith.truncf %25 : vector<8x32xf32> to vector<8x32xbf16>
    %c0_10 = arith.constant 0 : index
    %c0_11 = arith.constant 0 : index
    %c0_12 = arith.constant 0 : index
    %27 = vector.load %arg5[%c0_10, %c0_11, %c0_12] : memref<2x32x16xbf16, #tpu.memory_space<vmem>>, vector<1x32x16xbf16>
    %28 = vector.shape_cast %27 : vector<1x32x16xbf16> to vector<32x16xbf16>
    %cst_13 = arith.constant dense<0.000000e+00> : vector<8x16xf32>
    %29 = tpu.matmul %26, %28, %cst_13 {dimension_numbers = #tpu.dot_dimension_numbers<[1], [0], [0], [1], [0, 0, 1, 1], [], []>} : vector<8x32xbf16>, vector<32x16xbf16>, vector<8x16xf32> -> vector<8x16xf32>
    %c0_14 = arith.constant 0 : index
    %c0_15 = arith.constant 0 : index
    %c0_16 = arith.constant 0 : index
    %30 = vector.load %arg6[%c0_14, %c0_15, %c0_16] : memref<2x1x16xf32, #tpu.memory_space<vmem>>, vector<1x1x16xf32>
    %31 = vector.shape_cast %30 : vector<1x1x16xf32> to vector<1x16xf32>
    %32 = vector.broadcast %31 : vector<1x16xf32> to vector<8x16xf32>
    %33 = arith.addf %29, %32 : vector<8x16xf32>
    %c0_17 = arith.constant 0 : index
    %c0_18 = arith.constant 0 : index
    %c0_19 = arith.constant 0 : index
    %34 = vector.load %arg7[%c0_17, %c0_18, %c0_19] : memref<2x32x16xbf16, #tpu.memory_space<vmem>>, vector<1x32x16xbf16>
    %35 = vector.shape_cast %34 : vector<1x32x16xbf16> to vector<32x16xbf16>
    %cst_20 = arith.constant dense<0.000000e+00> : vector<8x16xf32>
    %36 = tpu.matmul %26, %35, %cst_20 {dimension_numbers = #tpu.dot_dimension_numbers<[1], [0], [0], [1], [0, 0, 1, 1], [], []>} : vector<8x32xbf16>, vector<32x16xbf16>, vector<8x16xf32> -> vector<8x16xf32>
    %c0_21 = arith.constant 0 : index
    %c0_22 = arith.constant 0 : index
    %c0_23 = arith.constant 0 : index
    %37 = vector.load %arg8[%c0_21, %c0_22, %c0_23] : memref<2x1x16xf32, #tpu.memory_space<vmem>>, vector<1x1x16xf32>
    %38 = vector.shape_cast %37 : vector<1x1x16xf32> to vector<1x16xf32>
    %39 = vector.broadcast %38 : vector<1x16xf32> to vector<8x16xf32>
    %40 = arith.addf %36, %39 : vector<8x16xf32>
    %c0_24 = arith.constant 0 : index
    %c0_25 = arith.constant 0 : index
    %c0_26 = arith.constant 0 : index
    %41 = vector.load %arg9[%c0_24, %c0_25, %c0_26] : memref<2x32x16xbf16, #tpu.memory_space<vmem>>, vector<1x32x16xbf16>
    %42 = vector.shape_cast %41 : vector<1x32x16xbf16> to vector<32x16xbf16>
    %cst_27 = arith.constant dense<0.000000e+00> : vector<8x16xf32>
    %43 = tpu.matmul %26, %42, %cst_27 {dimension_numbers = #tpu.dot_dimension_numbers<[1], [0], [0], [1], [0, 0, 1, 1], [], []>} : vector<8x32xbf16>, vector<32x16xbf16>, vector<8x16xf32> -> vector<8x16xf32>
    %c0_28 = arith.constant 0 : index
    %c0_29 = arith.constant 0 : index
    %c0_30 = arith.constant 0 : index
    %44 = vector.load %arg10[%c0_28, %c0_29, %c0_30] : memref<2x1x16xf32, #tpu.memory_space<vmem>>, vector<1x1x16xf32>
    %45 = vector.shape_cast %44 : vector<1x1x16xf32> to vector<1x16xf32>
    %46 = vector.broadcast %45 : vector<1x16xf32> to vector<8x16xf32>
    %47 = arith.addf %43, %46 : vector<8x16xf32>
    %48 = arith.truncf %33 : vector<8x16xf32> to vector<8x16xbf16>
    %c0_31 = arith.constant 0 : index
    %c0_32 = arith.constant 0 : index
    %c0_33 = arith.constant 0 : index
    %c0_34 = arith.constant 0 : index
    %49 = vector.load %arg11[%c0_31, %c0_32, %c0_33, %c0_34] : memref<1x2x8x16xbf16, #tpu.memory_space<vmem>>, vector<1x1x8x16xbf16>
    %50 = vector.shape_cast %49 : vector<1x1x8x16xbf16> to vector<8x16xbf16>
    %51 = vector.shape_cast %48 : vector<8x16xbf16> to vector<1x1x8x16xbf16>
    tpu.vector_store %arg11[%c0_31, %c0_32, %c0_33, %c0_34], %51 {strides = array<i32>} : memref<1x2x8x16xbf16, #tpu.memory_space<vmem>>, vector<1x1x8x16xbf16>,
    %52 = arith.truncf %40 : vector<8x16xf32> to vector<8x16xbf16>
    %c0_35 = arith.constant 0 : index
    %c0_36 = arith.constant 0 : index
    %c0_37 = arith.constant 0 : index
    %c0_38 = arith.constant 0 : index
    %53 = vector.load %arg12[%c0_35, %c0_36, %c0_37, %c0_38] : memref<1x2x8x16xbf16, #tpu.memory_space<vmem>>, vector<1x1x8x16xbf16>
    %54 = vector.shape_cast %53 : vector<1x1x8x16xbf16> to vector<8x16xbf16>
    %55 = vector.shape_cast %52 : vector<8x16xbf16> to vector<1x1x8x16xbf16>
    tpu.vector_store %arg12[%c0_35, %c0_36, %c0_37, %c0_38], %55 {strides = array<i32>} : memref<1x2x8x16xbf16, #tpu.memory_space<vmem>>, vector<1x1x8x16xbf16>,
    %56 = arith.truncf %47 : vector<8x16xf32> to vector<8x16xbf16>
    %c0_39 = arith.constant 0 : index
    %c0_40 = arith.constant 0 : index
    %c0_41 = arith.constant 0 : index
    %c0_42 = arith.constant 0 : index
    %57 = vector.load %arg13[%c0_39, %c0_40, %c0_41, %c0_42] : memref<1x2x8x16xbf16, #tpu.memory_space<vmem>>, vector<1x1x8x16xbf16>
    %58 = vector.shape_cast %57 : vector<1x1x8x16xbf16> to vector<8x16xbf16>
    %59 = vector.shape_cast %56 : vector<8x16xbf16> to vector<1x1x8x16xbf16>
    tpu.vector_store %arg13[%c0_39, %c0_40, %c0_41, %c0_42], %59 {strides = array<i32>} : memref<1x2x8x16xbf16, #tpu.memory_space<vmem>>, vector<1x1x8x16xbf16>,
    %c1 = arith.constant 1 : index
    %c0_43 = arith.constant 0 : index
    %c0_44 = arith.constant 0 : index
    %60 = vector.load %arg5[%c1, %c0_43, %c0_44] : memref<2x32x16xbf16, #tpu.memory_space<vmem>>, vector<1x32x16xbf16>
    %61 = vector.shape_cast %60 : vector<1x32x16xbf16> to vector<32x16xbf16>
    %cst_45 = arith.constant dense<0.000000e+00> : vector<8x16xf32>
    %62 = tpu.matmul %26, %61, %cst_45 {dimension_numbers = #tpu.dot_dimension_numbers<[1], [0], [0], [1], [0, 0, 1, 1], [], []>} : vector<8x32xbf16>, vector<32x16xbf16>, vector<8x16xf32> -> vector<8x16xf32>
    %c1_46 = arith.constant 1 : index
    %c0_47 = arith.constant 0 : index
    %c0_48 = arith.constant 0 : index
    %63 = vector.load %arg6[%c1_46, %c0_47, %c0_48] : memref<2x1x16xf32, #tpu.memory_space<vmem>>, vector<1x1x16xf32>
    %64 = vector.shape_cast %63 : vector<1x1x16xf32> to vector<1x16xf32>
    %65 = vector.broadcast %64 : vector<1x16xf32> to vector<8x16xf32>
    %66 = arith.addf %62, %65 : vector<8x16xf32>
    %c1_49 = arith.constant 1 : index
    %c0_50 = arith.constant 0 : index
    %c0_51 = arith.constant 0 : index
    %67 = vector.load %arg7[%c1_49, %c0_50, %c0_51] : memref<2x32x16xbf16, #tpu.memory_space<vmem>>, vector<1x32x16xbf16>
    %68 = vector.shape_cast %67 : vector<1x32x16xbf16> to vector<32x16xbf16>
    %cst_52 = arith.constant dense<0.000000e+00> : vector<8x16xf32>
    %69 = tpu.matmul %26, %68, %cst_52 {dimension_numbers = #tpu.dot_dimension_numbers<[1], [0], [0], [1], [0, 0, 1, 1], [], []>} : vector<8x32xbf16>, vector<32x16xbf16>, vector<8x16xf32> -> vector<8x16xf32>
    %c1_53 = arith.constant 1 : index
    %c0_54 = arith.constant 0 : index
    %c0_55 = arith.constant 0 : index
    %70 = vector.load %arg8[%c1_53, %c0_54, %c0_55] : memref<2x1x16xf32, #tpu.memory_space<vmem>>, vector<1x1x16xf32>
    %71 = vector.shape_cast %70 : vector<1x1x16xf32> to vector<1x16xf32>
    %72 = vector.broadcast %71 : vector<1x16xf32> to vector<8x16xf32>
    %73 = arith.addf %69, %72 : vector<8x16xf32>
    %c1_56 = arith.constant 1 : index
    %c0_57 = arith.constant 0 : index
    %c0_58 = arith.constant 0 : index
    %74 = vector.load %arg9[%c1_56, %c0_57, %c0_58] : memref<2x32x16xbf16, #tpu.memory_space<vmem>>, vector<1x32x16xbf16>
    %75 = vector.shape_cast %74 : vector<1x32x16xbf16> to vector<32x16xbf16>
    %cst_59 = arith.constant dense<0.000000e+00> : vector<8x16xf32>
    %76 = tpu.matmul %26, %75, %cst_59 {dimension_numbers = #tpu.dot_dimension_numbers<[1], [0], [0], [1], [0, 0, 1, 1], [], []>} : vector<8x32xbf16>, vector<32x16xbf16>, vector<8x16xf32> -> vector<8x16xf32>
    %c1_60 = arith.constant 1 : index
    %c0_61 = arith.constant 0 : index
    %c0_62 = arith.constant 0 : index
    %77 = vector.load %arg10[%c1_60, %c0_61, %c0_62] : memref<2x1x16xf32, #tpu.memory_space<vmem>>, vector<1x1x16xf32>
    %78 = vector.shape_cast %77 : vector<1x1x16xf32> to vector<1x16xf32>
    %79 = vector.broadcast %78 : vector<1x16xf32> to vector<8x16xf32>
    %80 = arith.addf %76, %79 : vector<8x16xf32>
    %81 = arith.truncf %66 : vector<8x16xf32> to vector<8x16xbf16>
    %c0_63 = arith.constant 0 : index
    %c1_64 = arith.constant 1 : index
    %c0_65 = arith.constant 0 : index
    %c0_66 = arith.constant 0 : index
    %82 = vector.load %arg11[%c0_63, %c1_64, %c0_65, %c0_66] : memref<1x2x8x16xbf16, #tpu.memory_space<vmem>>, vector<1x1x8x16xbf16>
    %83 = vector.shape_cast %82 : vector<1x1x8x16xbf16> to vector<8x16xbf16>
    %84 = vector.shape_cast %81 : vector<8x16xbf16> to vector<1x1x8x16xbf16>
    tpu.vector_store %arg11[%c0_63, %c1_64, %c0_65, %c0_66], %84 {strides = array<i32>} : memref<1x2x8x16xbf16, #tpu.memory_space<vmem>>, vector<1x1x8x16xbf16>,
    %85 = arith.truncf %73 : vector<8x16xf32> to vector<8x16xbf16>
    %c0_67 = arith.constant 0 : index
    %c1_68 = arith.constant 1 : index
    %c0_69 = arith.constant 0 : index
    %c0_70 = arith.constant 0 : index
    %86 = vector.load %arg12[%c0_67, %c1_68, %c0_69, %c0_70] : memref<1x2x8x16xbf16, #tpu.memory_space<vmem>>, vector<1x1x8x16xbf16>
    %87 = vector.shape_cast %86 : vector<1x1x8x16xbf16> to vector<8x16xbf16>
    %88 = vector.shape_cast %85 : vector<8x16xbf16> to vector<1x1x8x16xbf16>
    tpu.vector_store %arg12[%c0_67, %c1_68, %c0_69, %c0_70], %88 {strides = array<i32>} : memref<1x2x8x16xbf16, #tpu.memory_space<vmem>>, vector<1x1x8x16xbf16>,
    %89 = arith.truncf %80 : vector<8x16xf32> to vector<8x16xbf16>
    %c0_71 = arith.constant 0 : index
    %c1_72 = arith.constant 1 : index
    %c0_73 = arith.constant 0 : index
    %c0_74 = arith.constant 0 : index
    %90 = vector.load %arg13[%c0_71, %c1_72, %c0_73, %c0_74] : memref<1x2x8x16xbf16, #tpu.memory_space<vmem>>, vector<1x1x8x16xbf16>
    %91 = vector.shape_cast %90 : vector<1x1x8x16xbf16> to vector<8x16xbf16>
    %92 = vector.shape_cast %89 : vector<8x16xbf16> to vector<1x1x8x16xbf16>
    tpu.vector_store %arg13[%c0_71, %c1_72, %c0_73, %c0_74], %92 {strides = array<i32>} : memref<1x2x8x16xbf16, #tpu.memory_space<vmem>>, vector<1x1x8x16xbf16>,
    return
  }
  func.func @transform_0(%arg0: i32, %arg1: i32) -> (i32, i32, i32) {
    %c0_i32 = arith.constant 0 : i32
    %c0_i32_0 = arith.constant 0 : i32
    return %arg0, %arg1, %c0_i32 : i32, i32, i32
  }
  func.func @transform_1(%arg0: i32, %arg1: i32) -> (i32, i32) {
    %c0_i32 = arith.constant 0 : i32
    %c0_i32_0 = arith.constant 0 : i32
    %c0_i32_1 = arith.constant 0 : i32
    return %c0_i32, %c0_i32_0 : i32, i32
  }
  func.func @transform_2(%arg0: i32, %arg1: i32) -> (i32, i32) {
    %c0_i32 = arith.constant 0 : i32
    %c0_i32_0 = arith.constant 0 : i32
    %c0_i32_1 = arith.constant 0 : i32
    return %c0_i32, %c0_i32_0 : i32, i32
  }
  func.func @transform_3(%arg0: i32, %arg1: i32) -> (i32, i32, i32) {
    %c0_i32 = arith.constant 0 : i32
    %c0_i32_0 = arith.constant 0 : i32
    %c0_i32_1 = arith.constant 0 : i32
    %c0_i32_2 = arith.constant 0 : i32
    return %c0_i32, %c0_i32_0, %c0_i32_1 : i32, i32, i32
  }
  func.func @transform_4(%arg0: i32, %arg1: i32) -> (i32, i32, i32) {
    %c0_i32 = arith.constant 0 : i32
    %c0_i32_0 = arith.constant 0 : i32
    %c0_i32_1 = arith.constant 0 : i32
    %c0_i32_2 = arith.constant 0 : i32
    return %c0_i32, %c0_i32_0, %c0_i32_1 : i32, i32, i32
  }
  func.func @transform_5(%arg0: i32, %arg1: i32) -> (i32, i32, i32) {
    %c0_i32 = arith.constant 0 : i32
    %c0_i32_0 = arith.constant 0 : i32
    %c0_i32_1 = arith.constant 0 : i32
    %c0_i32_2 = arith.constant 0 : i32
    return %c0_i32, %c0_i32_0, %c0_i32_1 : i32, i32, i32
  }
  func.func @transform_6(%arg0: i32, %arg1: i32) -> (i32, i32, i32) {
    %c0_i32 = arith.constant 0 : i32
    %c0_i32_0 = arith.constant 0 : i32
    %c0_i32_1 = arith.constant 0 : i32
    %c0_i32_2 = arith.constant 0 : i32
    return %c0_i32, %c0_i32_0, %c0_i32_1 : i32, i32, i32
  }
  func.func @transform_7(%arg0: i32, %arg1: i32) -> (i32, i32, i32) {
    %c0_i32 = arith.constant 0 : i32
    %c0_i32_0 = arith.constant 0 : i32
    %c0_i32_1 = arith.constant 0 : i32
    %c0_i32_2 = arith.constant 0 : i32
    return %c0_i32, %c0_i32_0, %c0_i32_1 : i32, i32, i32
  }
  func.func @transform_8(%arg0: i32, %arg1: i32) -> (i32, i32, i32) {
    %c0_i32 = arith.constant 0 : i32
    %c0_i32_0 = arith.constant 0 : i32
    %c0_i32_1 = arith.constant 0 : i32
    %c0_i32_2 = arith.constant 0 : i32
    return %c0_i32, %c0_i32_0, %c0_i32_1 : i32, i32, i32
  }
  func.func @transform_9(%arg0: i32, %arg1: i32) -> (i32, i32, i32, i32) {
    %c0_i32 = arith.constant 0 : i32
    %c0_i32_0 = arith.constant 0 : i32
    %c0_i32_1 = arith.constant 0 : i32
    return %arg0, %c0_i32, %arg1, %c0_i32_0 : i32, i32, i32, i32
  }
  func.func @transform_10(%arg0: i32, %arg1: i32) -> (i32, i32, i32, i32) {
    %c0_i32 = arith.constant 0 : i32
    %c0_i32_0 = arith.constant 0 : i32
    %c0_i32_1 = arith.constant 0 : i32
    return %arg0, %c0_i32, %arg1, %c0_i32_0 : i32, i32, i32, i32
  }
  func.func @transform_11(%arg0: i32, %arg1: i32) -> (i32, i32, i32, i32) {
    %c0_i32 = arith.constant 0 : i32
    %c0_i32_0 = arith.constant 0 : i32
    %c0_i32_1 = arith.constant 0 : i32
    return %arg0, %c0_i32, %arg1, %c0_i32_0 : i32, i32, i32, i32
  }
}

</mosaic_0001>

<bundles_post_ra>
// kernel: tpu_custom_call.1
= control target key start
LH: loop header
LB: loop body
LE: loop exit
PB: predicated region body
PF: predicated region fallthrough
CT: control target
= control target key end

     0   :  { %s1787_s0 = inlined_call_operand.vmem [shape: f32[2,8,32], index: 0, kind: input, shape index: {}]   ;;  %s1788_s1 = inlined_call_operand.vmem [shape: f32[1,32], index: 1, kind: input, shape index: {}]   ;;  %s1789_s2 = inlined_call_operand.vmem [shape: f32[1,32], index: 2, kind: input, shape index: {}]   ;;  %s1790_s3 = inlined_call_operand.vmem [shape: bf16[2,32,16], index: 3, kind: input, shape index: {}]   ;;  %s1791_s4 = inlined_call_operand.vmem [shape: f32[2,1,16], index: 4, kind: input, shape index: {}]   ;;  %s1792_s5 = inlined_call_operand.vmem [shape: bf16[2,32,16], index: 5, kind: input, shape index: {}]   ;;  %s1793_s6 = inlined_call_operand.vmem [shape: f32[2,1,16], index: 6, kind: input, shape index: {}]   ;;  %s1794_s7 = inlined_call_operand.vmem [shape: bf16[2,32,16], index: 7, kind: input, shape index: {}]   ;;  %s1795_s8 = inlined_call_operand.vmem [shape: f32[2,1,16], index: 8, kind: input, shape index: {}]   ;;  %s1796_s9 = inlined_call_operand.hbm [shape: bf16[2,2,8,16], index: 9, kind: output, shape index: {0}]   ;;  %s1797_s10 = inlined_call_operand.hbm [shape: bf16[2,2,8,16], index: 10, kind: output, shape index: {1}]   ;;  %s1798_s11 = inlined_call_operand.hbm [shape: bf16[2,2,8,16], index: 11, kind: output, shape index: {2}]  }
   0x1   :  { %1806 = sst [smem:[#allocation9_spill]] %s1787_s0 }
   0x2   :  { %1807 = sst [smem:[#allocation10_spill]] %s1788_s1 }
   0x3   :  { %1808 = sst [smem:[#allocation11_spill]] %s1789_s2 }
   0x4   :  { %1809 = sst [smem:[#allocation12_spill]] %s1790_s3 }
   0x5   :  { %1810 = sst [smem:[#allocation13_spill]] %s1791_s4 }
   0x6   :  { %17 = vsyncpa [#allocation3], 0 }
   0x7   :  { %19 = vsyncpa [#allocation3 + $0x1], 0 }
   0x8   :  { %20 = vsyncpa [#allocation5], 0 }
   0x9   :  { %22 = vsyncpa [#allocation5 + $0x1], 0  ;;  %s1488_s17 = smov 0   ;;  %s1490_s18 = smov 0  }
   0xa   :  { %s1492_s19 = smov 0   ;;  %s1494_s20 = smov 0  }
   0xb   :  { %s1496_s21 = smov 0   ;;  %s1498_s22 = smov 0  }
   0xc LB: > { %s1800_s23 = sadd.s32 4294967295, %s1419_s22   ;;  %s1799_s24 = sadd.s32 4294967294, %s1419_s22   ;;  %s1419_s22 = sphi %s1498_s22, %s28_s22   ;;  %s1415_s21 = sphi %s1496_s21, %s1827_s21   ;;  %s1411_s20 = sphi %s1494_s20, %s1826_s20   ;;  %s1407_s19 = sphi %s1492_s19, %s1825_s19   ;;  %s1403_s18 = sphi %s1490_s18, %s1824_s18   ;;  %s1399_s17 = sphi %s1488_s17, %s1823_s17  }
   0xd   : > { %s40_s25 = sadd.s32 1, %s1415_s21  ;;  %s245_s26 = sadd.s32 1, %s1407_s19 }
   0xe   : > { %p42_p0 = scmp.ge.s32.totalorder %s40_s25, 2  ;;  %p255_p1 = scmp.ne.s32.totalorder %s1407_s19, %s1403_s18 }
   0xf   : > { %p256_p2 = scmp.eq.s32.totalorder %s1800_s23, 1  ;;  %p261_p3 = scmp.ne.s32.totalorder %s1403_s18, %s1399_s17 }
  0x10   : > { %s1829_s25 = smov (%p42_p0, %s40_s25), 0  ;;  %p262_p5 = scmp.eq.s32.totalorder %s1799_s24, 1 }
  0x11   : > { %p1530_p4 = por %p256_p2, %p255_p1  ;;  %s240_s28 = ssub.s32 %s1415_s21, %s1829_s25 }
  0x12   : > { %p1069_p6 = scmp.ge.s32.totalorder %s1419_s22, 1  ;;  %p243_p7 = scmp.eq.s32.totalorder %s240_s28, 0 }
  0x13   : > { %p1539_p8 = por %p262_p5, %p261_p3  ;;  %p370_p9 = scmp.lt.s32.totalorder %s1419_s22, 3 }
  0x14   : > { %s1545_s30 = scalar_select %p243_p7, %s1407_s19, %s245_s26  }
  0x15   : > { %p371_p10 = pnand %p1069_p6, %p370_p9 }
  0x16   : > { %p422_p11 = scmp.lt.s32.totalorder (!%p371_p10), %s1411_s20, 1  ;;  %vm431_vm0 = vcmask (!%p371_p10), 261120   ;;  %s1813_s0 = sld [smem:[#allocation9_spill]] (!%p371_p10)  ;;  %v1268_v8 = vld [vmem:[%s1792_s5] sm:$0xff] (!%p371_p10)   ;;  %v1421_v9 = vmov (!%p371_p10), 0.0   ;;  %v1270_v11 = vld [vmem:[%s1792_s5 + $0x8] sm:$0xff] (!%p371_p10)  }
  0x17   : > { %374 = sbr.rel (%p371_p10) target bundleno = 644 (0x284), region = 56  ;;  %s1814_s3 = sld [smem:[#allocation12_spill]] (!%p371_p10)  ;;  %1150 = vmatprep.subr.bf16.mxu0 (!%p371_p10), %v1421_v9  ;;  %1158 = vmatprep.subr.bf16.mxu1 (!%p371_p10), %v1421_v9  ;;  %vm1422_vm1 = vmmov (!%p371_p10), 0   ;;  %v1271_v21 = vld [vmem:[%s1794_s7] sm:$0xff] (!%p371_p10)   ;;  %v1273_v24 = vld [vmem:[%s1794_s7 + $0x8] sm:$0xff] (!%p371_p10)   ;;  %v1275_v26 = vld [vmem:[%s1792_s5 + $0x10] sm:$0xff] (!%p371_p10)  }
  0x18   : > { %1159 = vmatpush3.bf16.msra.mxu1 (!%p371_p10), %v1268_v8  ;;  %1154 = vmatprep.mubr.msk.bf16.mxu0 (!%p371_p10), %vm1422_vm1, %v1421_v9  ;;  %s1815_s1 = sld [smem:[#allocation10_spill]] (!%p371_p10)  ;;  %s1816_s2 = sld [smem:[#allocation11_spill]] (!%p371_p10)  ;;  %v1276_v27 = vld [vmem:[%s1794_s7 + $0x10] sm:$0xff] (!%p371_p10)   ;;  %v1277_v28 = vld [vmem:[%s1792_s5 + $0x18] sm:$0xff] (!%p371_p10)   ;;  %v1080_v31 = vld [vmem:[%s1793_s6] ss:$0 sm:$0xff] (!%p371_p10) }
  0x19   : > { %1160 = vmatprep.subr.bf16.mxu1 (!%p371_p10), %v1421_v9  ;;  %1162 = vmatprep.mubr.msk.bf16.mxu1 (!%p371_p10), %vm1422_vm1, %v1421_v9  ;;  %v1278_v29 = vld [vmem:[%s1794_s7 + $0x18] sm:$0xff] (!%p371_p10)   ;;  %s1817_s4 = sld [smem:[#allocation13_spill]] (!%p371_p10)  ;;  %vm656_vm2 = vcmask (!%p371_p10), 125952   ;;  %v1084_v44 = vld [vmem:[%s1795_s8] ss:$0 sm:$0xff] (!%p371_p10) }
  0x1a   : > { %v1102_v58 = vld [vmem:[%s1793_s6 + $0x1] ss:$0 sm:$0xff] (!%p371_p10) }
  0x1b   : > { %v1111_v59 = vld [vmem:[%s1795_s8 + $0x1] ss:$0 sm:$0xff] (!%p371_p10) }
  0x1c   : > { %1161 = vmatpush3.bf16.msra.mxu1 (!%p371_p10), %v1270_v11 }
  0x1d   : > { %v1267_v7 = vld [vmem:[%s1814_s3] sm:$0xff] (!%p371_p10)   ;;  %v1269_v10 = vld [vmem:[%s1814_s3 + $0x8] sm:$0xff] (!%p371_p10)   ;;  %1174 = vmatprep.subr.bf16.mxu1 (!%p371_p10), %v1421_v9  ;;  %v1272_v22 = vld [vmem:[%s1814_s3 + $0x10] sm:$0xff] (!%p371_p10)  }
  0x1e   : > { %s423_s12 = scalar_select %p422_p11, %s1411_s20, 1  ;;  %1151 = vmatpush3.bf16.msra.mxu0 %v1267_v7  ;;  %v1074_v16 = vld [vmem:[%s1815_s1] ss:$0 sm:$0xff]  ;;  %v1274_v25 = vld [vmem:[%s1814_s3 + $0x18] sm:$0xff]  }
  0x1f   : > { %1152 = vmatprep.subr.bf16.mxu0 %v1421_v9  ;;  %v1075_v18 = vld [vmem:[%s1816_s2] ss:$0 sm:$0xff]  ;;  %v1093_v45 = vld [vmem:[%s1817_s4 + $0x1] ss:$0 sm:$0xff]  ;;  %s1818_s3 = sand.u32 1, %s1403_s18  }
  0x20   : > { %s1073_s13 = sshll.u32 %s423_s12, 3  ;;  %v1076_v30 = vld [vmem:[%s1817_s4] ss:$0 sm:$0xff]  ;;  %s1657_s23 = scalar_lea.sflag [#allocation3], %s1818_s3 }
  0x21   : > { %s428_s16 = scalar_lea.vmem %s1813_s0, %s1073_s13  ;;  %s1801_s13 = sand.u32 1, %s1403_s18  }
  0x22   : > { %v430_v0 = vld [vmem:[%s428_s16] sm:$0xff]  ;;  %1153 = vmatpush3.bf16.msra.mxu0 %v1269_v10  ;;  %s1617_s26 = sshll.u32 %s1801_s13, 3  ;;  %s1633_s13 = sshll.u32 %s1411_s20, 7 }
  0x23   : > { %v432_v1 = vsel %vm431_vm0, %v430_v0, 0.0  ;;  %1166 = vmatprep.subr.bf16.mxu0 %v1421_v9  ;;  %s407_s28 = scalar_lea.vmem [#allocation2], %s1617_s26  ;;  %s1622_s12 = scalar_lea.vmem [#allocation4], %s1617_s26 }
  0x24   : > { %433 = vadd.xlane.f32.xlu0 %v432_v1  ;;  %s891_s14 = sshll.u32 %s407_s28, 4  ;;  %s1641_s15 = scalar_lea.hbm %s1796_s9, %s1633_s13  ;;  %s1635_s14 = int_to_ptr.vmem [resolvable:$true] %s891_s14 }
  0x25   : > { %s1644_s16 = scalar_lea.vmem [#allocation6], %s1617_s26  ;;  %s1281_s20 = scalar_lea.vmem %s1635_s14, 128 }
  0x26   : > { %p1282_p12 = scmp.ne.s32.totalorder %s1635_s14, %s1281_s20  ;;  %s1423_s26 = smov [#allocation2]  }
  0x27   : > { %s1285_s4 = sshll.u32 %s1423_s26, 4  ;;  %s1286_s4 = int_to_ptr.vmem [resolvable:$false] %s1285_s4 }
  0x28   : > { %p1283_p13 = pnand %p1282_p12, %p1530_p4  ;;  %p1288_p1 = scmp.lt.s32.totalorder %s1635_s14, %s1286_s4 }
  0x2a   : > { %p1284_p0 = pneg %p1283_p13 }
  0xb1   : > { %v434_v2 = vpop.xlane.xlu0 %433 }
  0xb2   : > { %v436_v3 = vmul.f32 0.03125, %v434_v2 }
  0xb4   : > { %v437_v4 = vsub.f32 %v430_v0, %v436_v3 }
  0xb6   : > { %v438_v5 = vmul.f32 %v437_v4, %v437_v4 }
  0xb8   : > { %v439_v6 = vsel %vm431_vm0, %v438_v5, 0.0 }
  0xb9   : > { %440 = vadd.xlane.f32.xlu0 %v439_v6 }
 0x146   : > { %v441_v12 = vpop.xlane.xlu0 %440 }
 0x147   : > { %v442_v13 = vmul.f32 0.03125, %v441_v12 }
 0x149   : > { %v443_v14 = vadd.f32 1e-05, %v442_v13 }
 0x14b   : > { %1279 = vrsqrt.f32 %v443_v14 }
 0x155   : > { %v1280_v15 = vpop.eup %1279 }
 0x156   : > { %v445_v17 = vmul.f32 %v1280_v15, %v437_v4 }
 0x158   : > { %v453_v19 = vmul.f32 %v1074_v16, %v445_v17 }
 0x15a   : > { %v461_v20 = vadd.f32 %v1075_v18, %v453_v19 }
 0x15c   : > { %v462_v23 = vpack.c.bf16 %v461_v20, %v461_v20 }
 0x15e   : > { %1155 = vmatmul.mubr.msk.bf16.vlgmr.msra.gmra.mrb[0].mxu0 %vm431_vm0, %v462_v23  ;;  %1163 = vmatmul.mubr.msk.bf16.vlgmr.msra.gmra.mrb[0].mxu1 %vm431_vm0, %v462_v23 }
 0x15f   : > { %1167 = vmatpush3.bf16.msra.mxu0 %v1271_v21  ;;  %1175 = vmatpush3.bf16.msra.mxu1 %v1272_v22 }
 0x160   : > { %1168 = vmatprep.subr.bf16.mxu0 %v1421_v9  ;;  %1176 = vmatprep.subr.bf16.mxu1 %v1421_v9 }
 0x161   : > { %1170 = vmatprep.mubr.msk.bf16.mxu0 %vm1422_vm1, %v1421_v9  ;;  %1178 = vmatprep.mubr.msk.bf16.mxu1 %vm1422_vm1, %v1421_v9 }
 0x163   : > { %1169 = vmatpush3.bf16.msra.mxu0 %v1273_v24  ;;  %1177 = vmatpush3.bf16.msra.mxu1 %v1274_v25 }
 0x164   : > { %1182 = vmatprep.subr.bf16.mxu0 %v1421_v9  ;;  %1190 = vmatprep.subr.bf16.mxu1 %v1421_v9 }
 0x166   : > { %1171 = vmatmul.mubr.msk.bf16.vlgmr.msra.gmra.mrb[4].mxu0 %vm431_vm0, %v462_v23  ;;  %1179 = vmatmul.mubr.msk.bf16.vlgmr.msra.gmra.mrb[4].mxu1 %vm431_vm0, %v462_v23 }
 0x167   : > { %1183 = vmatpush3.bf16.msra.mxu0 %v1275_v26  ;;  %1191 = vmatpush3.bf16.msra.mxu1 %v1276_v27 }
 0x168   : > { %1184 = vmatprep.subr.bf16.mxu0 %v1421_v9  ;;  %1192 = vmatprep.subr.bf16.mxu1 %v1421_v9 }
 0x169   : > { %1186 = vmatprep.mubr.msk.bf16.mxu0 %vm1422_vm1, %v1421_v9  ;;  %1194 = vmatprep.mubr.msk.bf16.mxu1 %vm1422_vm1, %v1421_v9 }
 0x16b   : > { %1185 = vmatpush3.bf16.msra.mxu0 %v1277_v28  ;;  %1193 = vmatpush3.bf16.msra.mxu1 %v1278_v29 }
 0x16e   : > { %1187 = vmatmul.mubr.msk.bf16.vlgmr.msra.gmra.mrb[8].mxu0 %vm431_vm0, %v462_v23  ;;  %1195 = vmatmul.mubr.msk.bf16.vlgmr.msra.gmra.mrb[8].mxu1 %vm431_vm0, %v462_v23 }
 0x231   : > { %v523_v32 = vpop.f32.mrb[0].mxu0  ;;  %v586_v33 = vpop.f32.mrb[0].mxu1 }
 0x232   : > { %v524_v34 = vadd.f32 %v1076_v30, %v523_v32  ;;  %v587_v35 = vadd.f32 %v1080_v31, %v586_v33  ;;  %v1156_v36 = vpop.f32.mrb[1].mxu0  ;;  %v1164_v37 = vpop.f32.mrb[1].mxu1 }
 0x233   : > { %v526_v38 = vpop.f32.mrb[2].mxu0  ;;  %v589_v39 = vpop.f32.mrb[2].mxu1 }
 0x234   : > { %v655_v40 = vpack.c.bf16 %v524_v34, %v524_v34  ;;  %v658_v41 = vpack.c.bf16 %v587_v35, %v587_v35  ;;  %v1157_v42 = vpop.f32.mrb[3].mxu0  ;;  %v1165_v43 = vpop.f32.mrb[3].mxu1 }
 0x236   : > { %657 = vst.msk [vmem:[%s407_s28] sm:$0xf] %vm656_vm2, %v655_v40  ;;  %659 = vst.msk [vmem:[%s1622_s12] sm:$0xf] %vm656_vm2, %v658_v41 }
 0x239   : > { %v649_v46 = vpop.f32.mrb[4].mxu0  ;;  %v721_v47 = vpop.f32.mrb[4].mxu1 }
 0x23a   : > { %v650_v48 = vadd.f32 %v1084_v44, %v649_v46  ;;  %v722_v49 = vadd.f32 %v1093_v45, %v721_v47  ;;  %v1172_v50 = vpop.f32.mrb[5].mxu0  ;;  %v1180_v51 = vpop.f32.mrb[5].mxu1 }
 0x23b   : > { %v652_v52 = vpop.f32.mrb[6].mxu0  ;;  %v724_v53 = vpop.f32.mrb[6].mxu1 }
 0x23c   : > { %v660_v54 = vpack.c.bf16 %v650_v48, %v650_v48  ;;  %v857_v55 = vpack.c.bf16 %v722_v49, %v722_v49  ;;  %v1173_v56 = vpop.f32.mrb[7].mxu0  ;;  %v1181_v57 = vpop.f32.mrb[7].mxu1 }
 0x23e   : > { %661 = vst.msk [vmem:[%s1644_s16] sm:$0xf] %vm656_vm2, %v660_v54  ;;  %1115 = vst.msk [vmem:[%s407_s28 + $0x4] sm:$0xf] %vm656_vm2, %v857_v55  ;;  %s1287_s28 = scalar_lea.vmem %s1286_s4, 256 }
 0x23f   : > { %p1289_p2 = scmp.lt.s32.totalorder %s1287_s28, %s1281_s20 }
 0x241   : > { %p1290_p3 = por %p1289_p2, %p1288_p1 }
 0x243   : > { %p1291_p5 = pnand %p1290_p3, %p1284_p0 }
 0x245   : > { %1294 = shalt.err (!%p1291_p5)
}
 0x246   : > { %s1295_s0 = scalar_lea.hbm %s1641_s15, 128  ;;  %s1299_s3 = scalar_lea.hbm %s1796_s9, 256 }
 0x247   : > { %p1296_p6 = scmp.ne.s32.totalorder %s1641_s15, %s1295_s0  ;;  %p1300_p10 = scmp.lt.u32.totalorder %s1641_s15, %s1796_s9 }
 0x248   : > { %p1301_p11 = scmp.lt.u32.totalorder %s1299_s3, %s1295_s0  ;;  %p1303_p13 = scmp.lt.u32.totalorder %s1295_s0, %s1641_s15 }
 0x249   : > { %p1297_p7 = pnand %p1296_p6, %p1530_p4 }
 0x24a   : > { %p1302_p12 = por %p1301_p11, %p1300_p10 }
 0x24b   : > { %p1298_p9 = pneg %p1297_p7 }
 0x24c   : > { %p1304_p0 = por %p1303_p13, %p1302_p12 }
 0x24e   : > { %p1305_p1 = pnand %p1304_p0, %p1298_p9 }
 0x250   : > { %1308 = shalt.err (!%p1305_p1)
}
 0x251   : > { %s1802_s20 = smov 64   ;;  %s1804_s26 = smov 4   ;;  %v786_v60 = vpop.f32.mrb[8].mxu0  ;;  %v851_v61 = vpop.f32.mrb[8].mxu1 }
 0x252   : > { %1198 = dma.vmem_to_hbm [thread:$0]  (%p1530_p4), %s1635_s14, 128, %s1641_s15, %s1657_s23, %s1802_s20, %s1802_s20, %s1804_s26   ;;  %v787_v62 = vadd.f32 %v1102_v58, %v786_v60  ;;  %v852_v63 = vadd.f32 %v1111_v59, %v851_v61  ;;  %v1188_v0 = vpop.f32.mrb[9].mxu0  ;;  %v1196_v1 = vpop.f32.mrb[9].mxu1 }
 0x253   : > { %s908_s28 = sshll.u32 %s1622_s12, 4  ;;  %s1819_s0 = sadd.s32 4294967295, %s1419_s22   ;;  %v789_v2 = vpop.f32.mrb[10].mxu0  ;;  %v854_v3 = vpop.f32.mrb[10].mxu1  ;;  %s1690_s28 = int_to_ptr.vmem [resolvable:$true] %s908_s28 }
 0x254   : > { %s1687_s1 = sand.u32 1, %s1819_s0   ;;  %s925_s2 = sshll.u32 %s1644_s16, 4  ;;  %v860_v4 = vpack.c.bf16 %v787_v62, %v787_v62  ;;  %v863_v5 = vpack.c.bf16 %v852_v63, %v852_v63  ;;  %v1189_v6 = vpop.f32.mrb[11].mxu0  ;;  %v1197_v7 = vpop.f32.mrb[11].mxu1  ;;  %s1698_s2 = int_to_ptr.vmem [resolvable:$true] %s925_s2 }
 0x255   : > { %s1696_s23 = scalar_lea.hbm %s1797_s10, %s1633_s13  ;;  %s1704_s4 = scalar_lea.hbm %s1798_s11, %s1633_s13 }
 0x256   : > { %1116 = vst.msk [vmem:[%s1622_s12 + $0x4] sm:$0xf] %vm656_vm2, %v860_v4  ;;  %1117 = vst.msk [vmem:[%s1644_s16 + $0x4] sm:$0xf] %vm656_vm2, %v863_v5  ;;  %s872_s0 = scalar_lea.sflag [#allocation5], %s1687_s1  ;;  %s1309_s20 = scalar_lea.vmem %s1690_s28, 128 }
 0x257   : > { %p1310_p2 = scmp.ne.s32.totalorder %s1690_s28, %s1309_s20  ;;  %s1426_s14 = smov [#allocation4]  }
 0x258   : > { %s1313_s15 = sshll.u32 %s1426_s14, 4  ;;  %s1314_s15 = int_to_ptr.vmem [resolvable:$false] %s1313_s15 }
 0x259   : > { %p1311_p3 = pnand %p1310_p2, %p1530_p4  ;;  %s1315_s26 = scalar_lea.vmem %s1314_s15, 256 }
 0x25a   : > { %p1316_p6 = scmp.lt.s32.totalorder %s1690_s28, %s1314_s15  ;;  %p1317_p7 = scmp.lt.s32.totalorder %s1315_s26, %s1309_s20 }
 0x25b   : > { %p1312_p5 = pneg %p1311_p3 }
 0x25c   : > { %p1318_p9 = por %p1317_p7, %p1316_p6 }
 0x25e   : > { %p1319_p10 = pnand %p1318_p9, %p1312_p5 }
 0x260   : > { %1322 = shalt.err (!%p1319_p10)
}
 0x261   : > { %s1323_s13 = scalar_lea.hbm %s1696_s23, 128  ;;  %s1327_s3 = scalar_lea.hbm %s1797_s10, 256 }
 0x262   : > { %p1324_p11 = scmp.ne.s32.totalorder %s1696_s23, %s1323_s13  ;;  %p1328_p0 = scmp.lt.u32.totalorder %s1696_s23, %s1797_s10 }
 0x263   : > { %p1329_p1 = scmp.lt.u32.totalorder %s1327_s3, %s1323_s13  ;;  %p1331_p3 = scmp.lt.u32.totalorder %s1323_s13, %s1696_s23 }
 0x264   : > { %p1325_p12 = pnand %p1324_p11, %p1530_p4 }
 0x265   : > { %p1330_p2 = por %p1329_p1, %p1328_p0 }
 0x266   : > { %p1326_p13 = pneg %p1325_p12 }
 0x267   : > { %p1332_p5 = por %p1331_p3, %p1330_p2 }
 0x269   : > { %p1333_p6 = pnand %p1332_p5, %p1326_p13 }
 0x26b   : > { %1336 = shalt.err (!%p1333_p6)
}
 0x26c   : > { %s1820_s20 = smov 4   ;;  %s1821_s26 = smov 64  }
 0x26d   : > { %1199 = dma.vmem_to_hbm [thread:$0]  (%p1530_p4), %s1690_s28, 128, %s1696_s23, %s872_s0, %s1821_s26, %s1821_s26, %s1820_s20  }
 0x26e   : > { %s1337_s15 = scalar_lea.vmem %s1698_s2, 128  ;;  %s1427_s13 = smov [#allocation6]  }
 0x26f   : > { %p1338_p7 = scmp.ne.s32.totalorder %s1698_s2, %s1337_s15  ;;  %s1341_s12 = sshll.u32 %s1427_s13, 4  ;;  %s1342_s12 = int_to_ptr.vmem [resolvable:$false] %s1341_s12 }
 0x270   : > { %s1343_s16 = scalar_lea.vmem %s1342_s12, 256  ;;  %p1344_p11 = scmp.lt.s32.totalorder %s1698_s2, %s1342_s12 }
 0x271   : > { %p1339_p9 = pnand %p1338_p7, %p1530_p4  ;;  %p1345_p12 = scmp.lt.s32.totalorder %s1343_s16, %s1337_s15 }
 0x273   : > { %p1340_p10 = pneg %p1339_p9  ;;  %p1346_p13 = por %p1345_p12, %p1344_p11 }
 0x275   : > { %p1347_p0 = pnand %p1346_p13, %p1340_p10 }
 0x277   : > { %1350 = shalt.err (!%p1347_p0)
}
 0x278   : > { %s1351_s28 = scalar_lea.hbm %s1704_s4, 128  ;;  %s1355_s24 = scalar_lea.hbm %s1798_s11, 256 }
 0x279   : > { %p1352_p1 = scmp.ne.s32.totalorder %s1704_s4, %s1351_s28  ;;  %p1356_p5 = scmp.lt.u32.totalorder %s1704_s4, %s1798_s11 }
 0x27a   : > { %p1357_p6 = scmp.lt.u32.totalorder %s1355_s24, %s1351_s28  ;;  %p1359_p9 = scmp.lt.u32.totalorder %s1351_s28, %s1704_s4 }
 0x27b   : > { %p1353_p2 = pnand %p1352_p1, %p1530_p4 }
 0x27c   : > { %p1358_p7 = por %p1357_p6, %p1356_p5 }
 0x27d   : > { %p1354_p3 = pneg %p1353_p2 }
 0x27e   : > { %p1360_p10 = por %p1359_p9, %p1358_p7 }
 0x280   : > { %p1361_p11 = pnand %p1360_p10, %p1354_p3 }
 0x282   : > { %1364 = shalt.err (!%p1361_p11)
}
 0x283   : > { %1200 = dma.vmem_to_hbm [thread:$0]  (%p1530_p4), %s1698_s2, 128, %s1704_s4, %s872_s0, %s1821_s26, %s1821_s26, %s1820_s20  }
 0x284 PF: > { %p1214_p12 = scmp.ge.s32.totalorder %s1419_s22, 2  ;;  %s940_s15 = sand.u32 1, %s1399_s17  }
 0x285   : > { %s941_s12 = scalar_lea.sflag [#allocation3], %s940_s15 }
 0x286   : > { %p1205_p13 = pnand %p1214_p12, %p1539_p8 }
 0x288   : > { %1390 = dma.done.wait (!%p1205_p13), %s941_s12, 128  }
 0x289   : > { %1392 = vsyncadd (!%p1205_p13), %s941_s12, 4294967168  ;;  %s1822_s27 = sadd.s32 4294967294, %s1419_s22  }
 0x28a   : > { %s949_s16 = sand.u32 1, %s1822_s27  }
 0x28b   : > { %s950_s28 = scalar_lea.sflag [#allocation5], %s949_s16 }
 0x28c   : > { %1394 = dma.done.wait (!%p1205_p13), %s950_s28, 256  }
 0x28d   : > { %1396 = vsyncadd (!%p1205_p13), %s950_s28, 4294967040  ;;  %s28_s22 = sadd.s32 1, %s1419_s22   ;;  %s1823_s17 = smov %s1403_s18 }
 0x28e   : > { %p25_p4 = scmp.ge.s32.totalorder %s28_s22, 4   ;;  %s1824_s18 = smov %s1407_s19 }
 0x28f   : > { %s1825_s19 = smov %s1545_s30  ;;  %s1826_s20 = smov %s1415_s21 }
 0x290   : > { %s1827_s21 = smov %s1829_s25  ;;  %27 = sbr.rel (!%p25_p4) target bundleno = 12 (0xc), region = 132 }
 0x297   :  { %964 = vsyncpa [#allocation3], 1 }
 0x298   :  { %966 = vsyncpa [#allocation3 + $0x1], 1 }
 0x299   :  { %967 = vsyncpa [#allocation5], 1 }
 0x29a   :  { %969 = vsyncpa [#allocation5 + $0x1], 1 }

// kernel: tpu_custom_call.1
= control target key start
LH: loop header
LB: loop body
LE: loop exit
PB: predicated region body
PF: predicated region fallthrough
CT: control target
= control target key end

     0   :  { %s1787_s0 = inlined_call_operand.vmem [shape: f32[2,8,32], index: 0, kind: input, shape index: {}]   ;;  %s1788_s1 = inlined_call_operand.vmem [shape: f32[1,32], index: 1, kind: input, shape index: {}]   ;;  %s1789_s2 = inlined_call_operand.vmem [shape: f32[1,32], index: 2, kind: input, shape index: {}]   ;;  %s1790_s3 = inlined_call_operand.vmem [shape: bf16[2,32,16], index: 3, kind: input, shape index: {}]   ;;  %s1791_s4 = inlined_call_operand.vmem [shape: f32[2,1,16], index: 4, kind: input, shape index: {}]   ;;  %s1792_s5 = inlined_call_operand.vmem [shape: bf16[2,32,16], index: 5, kind: input, shape index: {}]   ;;  %s1793_s6 = inlined_call_operand.vmem [shape: f32[2,1,16], index: 6, kind: input, shape index: {}]   ;;  %s1794_s7 = inlined_call_operand.vmem [shape: bf16[2,32,16], index: 7, kind: input, shape index: {}]   ;;  %s1795_s8 = inlined_call_operand.vmem [shape: f32[2,1,16], index: 8, kind: input, shape index: {}]   ;;  %s1796_s9 = inlined_call_operand.hbm [shape: bf16[2,2,8,16], index: 9, kind: output, shape index: {0}]   ;;  %s1797_s10 = inlined_call_operand.hbm [shape: bf16[2,2,8,16], index: 10, kind: output, shape index: {1}]   ;;  %s1798_s11 = inlined_call_operand.hbm [shape: bf16[2,2,8,16], index: 11, kind: output, shape index: {2}]  }
   0x1   :  { %1806 = sst [smem:[#allocation9_spill]] %s1787_s0 }
   0x2   :  { %1807 = sst [smem:[#allocation10_spill]] %s1788_s1 }
   0x3   :  { %1808 = sst [smem:[#allocation11_spill]] %s1789_s2 }
   0x4   :  { %1809 = sst [smem:[#allocation12_spill]] %s1790_s3 }
   0x5   :  { %1810 = sst [smem:[#allocation13_spill]] %s1791_s4 }
   0x6   :  { %17 = vsyncpa [#allocation3], 0 }
   0x7   :  { %19 = vsyncpa [#allocation3 + $0x1], 0 }
   0x8   :  { %20 = vsyncpa [#allocation5], 0 }
   0x9   :  { %22 = vsyncpa [#allocation5 + $0x1], 0  ;;  %s1488_s17 = smov 0   ;;  %s1490_s18 = smov 0  }
   0xa   :  { %s1492_s19 = smov 0   ;;  %s1494_s20 = smov 0  }
   0xb   :  { %s1496_s21 = smov 0   ;;  %s1498_s22 = smov 0  }
   0xc LB: > { %s1800_s23 = sadd.s32 4294967295, %s1419_s22   ;;  %s1799_s24 = sadd.s32 4294967294, %s1419_s22   ;;  %s1419_s22 = sphi %s1498_s22, %s28_s22   ;;  %s1415_s21 = sphi %s1496_s21, %s1827_s21   ;;  %s1411_s20 = sphi %s1494_s20, %s1826_s20   ;;  %s1407_s19 = sphi %s1492_s19, %s1825_s19   ;;  %s1403_s18 = sphi %s1490_s18, %s1824_s18   ;;  %s1399_s17 = sphi %s1488_s17, %s1823_s17  }
   0xd   : > { %s40_s25 = sadd.s32 1, %s1415_s21  ;;  %s245_s26 = sadd.s32 1, %s1407_s19 }
   0xe   : > { %p42_p0 = scmp.ge.s32.totalorder %s40_s25, 2  ;;  %p255_p1 = scmp.ne.s32.totalorder %s1407_s19, %s1403_s18 }
   0xf   : > { %p256_p2 = scmp.eq.s32.totalorder %s1800_s23, 1  ;;  %p261_p3 = scmp.ne.s32.totalorder %s1403_s18, %s1399_s17 }
  0x10   : > { %s1829_s25 = smov (%p42_p0, %s40_s25), 0  ;;  %p262_p5 = scmp.eq.s32.totalorder %s1799_s24, 1 }
  0x11   : > { %p1530_p4 = por %p256_p2, %p255_p1  ;;  %s240_s28 = ssub.s32 %s1415_s21, %s1829_s25 }
  0x12   : > { %p1069_p6 = scmp.ge.s32.totalorder %s1419_s22, 1  ;;  %p243_p7 = scmp.eq.s32.totalorder %s240_s28, 0 }
  0x13   : > { %p1539_p8 = por %p262_p5, %p261_p3  ;;  %p370_p9 = scmp.lt.s32.totalorder %s1419_s22, 3 }
  0x14   : > { %s1545_s30 = scalar_select %p243_p7, %s1407_s19, %s245_s26  }
  0x15   : > { %p371_p10 = pnand %p1069_p6, %p370_p9 }
  0x16   : > { %p422_p11 = scmp.lt.s32.totalorder (!%p371_p10), %s1411_s20, 1  ;;  %vm431_vm0 = vcmask (!%p371_p10), 261120   ;;  %s1813_s0 = sld [smem:[#allocation9_spill]] (!%p371_p10)  ;;  %v1268_v8 = vld [vmem:[%s1792_s5] sm:$0xff] (!%p371_p10)   ;;  %v1421_v9 = vmov (!%p371_p10), 0.0   ;;  %v1270_v11 = vld [vmem:[%s1792_s5 + $0x8] sm:$0xff] (!%p371_p10)  }
  0x17   : > { %374 = sbr.rel (%p371_p10) target bundleno = 644 (0x284), region = 56  ;;  %s1814_s3 = sld [smem:[#allocation12_spill]] (!%p371_p10)  ;;  %1150 = vmatprep.subr.bf16.mxu0 (!%p371_p10), %v1421_v9  ;;  %1158 = vmatprep.subr.bf16.mxu1 (!%p371_p10), %v1421_v9  ;;  %vm1422_vm1 = vmmov (!%p371_p10), 0   ;;  %v1271_v21 = vld [vmem:[%s1794_s7] sm:$0xff] (!%p371_p10)   ;;  %v1273_v24 = vld [vmem:[%s1794_s7 + $0x8] sm:$0xff] (!%p371_p10)   ;;  %v1275_v26 = vld [vmem:[%s1792_s5 + $0x10] sm:$0xff] (!%p371_p10)  }
  0x18   : > { %1159 = vmatpush3.bf16.msra.mxu1 (!%p371_p10), %v1268_v8  ;;  %1154 = vmatprep.mubr.msk.bf16.mxu0 (!%p371_p10), %vm1422_vm1, %v1421_v9  ;;  %s1815_s1 = sld [smem:[#allocation10_spill]] (!%p371_p10)  ;;  %s1816_s2 = sld [smem:[#allocation11_spill]] (!%p371_p10)  ;;  %v1276_v27 = vld [vmem:[%s1794_s7 + $0x10] sm:$0xff] (!%p371_p10)   ;;  %v1277_v28 = vld [vmem:[%s1792_s5 + $0x18] sm:$0xff] (!%p371_p10)   ;;  %v1080_v31 = vld [vmem:[%s1793_s6] ss:$0 sm:$0xff] (!%p371_p10) }
  0x19   : > { %1160 = vmatprep.subr.bf16.mxu1 (!%p371_p10), %v1421_v9  ;;  %1162 = vmatprep.mubr.msk.bf16.mxu1 (!%p371_p10), %vm1422_vm1, %v1421_v9  ;;  %v1278_v29 = vld [vmem:[%s1794_s7 + $0x18] sm:$0xff] (!%p371_p10)   ;;  %s1817_s4 = sld [smem:[#allocation13_spill]] (!%p371_p10)  ;;  %vm656_vm2 = vcmask (!%p371_p10), 125952   ;;  %v1084_v44 = vld [vmem:[%s1795_s8] ss:$0 sm:$0xff] (!%p371_p10) }
  0x1a   : > { %v1102_v58 = vld [vmem:[%s1793_s6 + $0x1] ss:$0 sm:$0xff] (!%p371_p10) }
  0x1b   : > { %v1111_v59 = vld [vmem:[%s1795_s8 + $0x1] ss:$0 sm:$0xff] (!%p371_p10) }
  0x1c   : > { %1161 = vmatpush3.bf16.msra.mxu1 (!%p371_p10), %v1270_v11 }
  0x1d   : > { %v1267_v7 = vld [vmem:[%s1814_s3] sm:$0xff] (!%p371_p10)   ;;  %v1269_v10 = vld [vmem:[%s1814_s3 + $0x8] sm:$0xff] (!%p371_p10)   ;;  %1174 = vmatprep.subr.bf16.mxu1 (!%p371_p10), %v1421_v9  ;;  %v1272_v22 = vld [vmem:[%s1814_s3 + $0x10] sm:$0xff] (!%p371_p10)  }
  0x1e   : > { %s423_s12 = scalar_select %p422_p11, %s1411_s20, 1  ;;  %1151 = vmatpush3.bf16.msra.mxu0 %v1267_v7  ;;  %v1074_v16 = vld [vmem:[%s1815_s1] ss:$0 sm:$0xff]  ;;  %v1274_v25 = vld [vmem:[%s1814_s3 + $0x18] sm:$0xff]  }
  0x1f   : > { %1152 = vmatprep.subr.bf16.mxu0 %v1421_v9  ;;  %v1075_v18 = vld [vmem:[%s1816_s2] ss:$0 sm:$0xff]  ;;  %v1093_v45 = vld [vmem:[%s1817_s4 + $0x1] ss:$0 sm:$0xff]  ;;  %s1818_s3 = sand.u32 1, %s1403_s18  }
  0x20   : > { %s1073_s13 = sshll.u32 %s423_s12, 3  ;;  %v1076_v30 = vld [vmem:[%s1817_s4] ss:$0 sm:$0xff]  ;;  %s1657_s23 = scalar_lea.sflag [#allocation3], %s1818_s3 }
  0x21   : > { %s428_s16 = scalar_lea.vmem %s1813_s0, %s1073_s13  ;;  %s1801_s13 = sand.u32 1, %s1403_s18  }
  0x22   : > { %v430_v0 = vld [vmem:[%s428_s16] sm:$0xff]  ;;  %1153 = vmatpush3.bf16.msra.mxu0 %v1269_v10  ;;  %s1617_s26 = sshll.u32 %s1801_s13, 3  ;;  %s1633_s13 = sshll.u32 %s1411_s20, 7 }
  0x23   : > { %v432_v1 = vsel %vm431_vm0, %v430_v0, 0.0  ;;  %1166 = vmatprep.subr.bf16.mxu0 %v1421_v9  ;;  %s407_s28 = scalar_lea.vmem [#allocation2], %s1617_s26  ;;  %s1622_s12 = scalar_lea.vmem [#allocation4], %s1617_s26 }
  0x24   : > { %433 = vadd.xlane.f32.xlu0 %v432_v1  ;;  %s891_s14 = sshll.u32 %s407_s28, 4  ;;  %s1641_s15 = scalar_lea.hbm %s1796_s9, %s1633_s13  ;;  %s1635_s14 = int_to_ptr.vmem [resolvable:$true] %s891_s14 }
  0x25   : > { %s1644_s16 = scalar_lea.vmem [#allocation6], %s1617_s26  ;;  %s1281_s20 = scalar_lea.vmem %s1635_s14, 128 }
  0x26   : > { %p1282_p12 = scmp.ne.s32.totalorder %s1635_s14, %s1281_s20  ;;  %s1423_s26 = smov [#allocation2]  }
  0x27   : > { %s1285_s4 = sshll.u32 %s1423_s26, 4  ;;  %s1286_s4 = int_to_ptr.vmem [resolvable:$false] %s1285_s4 }
  0x28   : > { %p1283_p13 = pnand %p1282_p12, %p1530_p4  ;;  %p1288_p1 = scmp.lt.s32.totalorder %s1635_s14, %s1286_s4 }
  0x2a   : > { %p1284_p0 = pneg %p1283_p13 }
  0xb1   : > { %v434_v2 = vpop.xlane.xlu0 %433 }
  0xb2   : > { %v436_v3 = vmul.f32 0.03125, %v434_v2 }
  0xb4   : > { %v437_v4 = vsub.f32 %v430_v0, %v436_v3 }
  0xb6   : > { %v438_v5 = vmul.f32 %v437_v4, %v437_v4 }
  0xb8   : > { %v439_v6 = vsel %vm431_vm0, %v438_v5, 0.0 }
  0xb9   : > { %440 = vadd.xlane.f32.xlu0 %v439_v6 }
 0x146   : > { %v441_v12 = vpop.xlane.xlu0 %440 }
 0x147   : > { %v442_v13 = vmul.f32 0.03125, %v441_v12 }
 0x149   : > { %v443_v14 = vadd.f32 1e-05, %v442_v13 }
 0x14b   : > { %1279 = vrsqrt.f32 %v443_v14 }
 0x155   : > { %v1280_v15 = vpop.eup %1279 }
 0x156   : > { %v445_v17 = vmul.f32 %v1280_v15, %v437_v4 }
 0x158   : > { %v453_v19 = vmul.f32 %v1074_v16, %v445_v17 }
 0x15a   : > { %v461_v20 = vadd.f32 %v1075_v18, %v453_v19 }
 0x15c   : > { %v462_v23 = vpack.c.bf16 %v461_v20, %v461_v20 }
 0x15e   : > { %1155 = vmatmul.mubr.msk.bf16.vlgmr.msra.gmra.mrb[0].mxu0 %vm431_vm0, %v462_v23  ;;  %1163 = vmatmul.mubr.msk.bf16.vlgmr.msra.gmra.mrb[0].mxu1 %vm431_vm0, %v462_v23 }
 0x15f   : > { %1167 = vmatpush3.bf16.msra.mxu0 %v1271_v21  ;;  %1175 = vmatpush3.bf16.msra.mxu1 %v1272_v22 }
 0x160   : > { %1168 = vmatprep.subr.bf16.mxu0 %v1421_v9  ;;  %1176 = vmatprep.subr.bf16.mxu1 %v1421_v9 }
 0x161   : > { %1170 = vmatprep.mubr.msk.bf16.mxu0 %vm1422_vm1, %v1421_v9  ;;  %1178 = vmatprep.mubr.msk.bf16.mxu1 %vm1422_vm1, %v1421_v9 }
 0x163   : > { %1169 = vmatpush3.bf16.msra.mxu0 %v1273_v24  ;;  %1177 = vmatpush3.bf16.msra.mxu1 %v1274_v25 }
 0x164   : > { %1182 = vmatprep.subr.bf16.mxu0 %v1421_v9  ;;  %1190 = vmatprep.subr.bf16.mxu1 %v1421_v9 }
 0x166   : > { %1171 = vmatmul.mubr.msk.bf16.vlgmr.msra.gmra.mrb[4].mxu0 %vm431_vm0, %v462_v23  ;;  %1179 = vmatmul.mubr.msk.bf16.vlgmr.msra.gmra.mrb[4].mxu1 %vm431_vm0, %v462_v23 }
 0x167   : > { %1183 = vmatpush3.bf16.msra.mxu0 %v1275_v26  ;;  %1191 = vmatpush3.bf16.msra.mxu1 %v1276_v27 }
 0x168   : > { %1184 = vmatprep.subr.bf16.mxu0 %v1421_v9  ;;  %1192 = vmatprep.subr.bf16.mxu1 %v1421_v9 }
 0x169   : > { %1186 = vmatprep.mubr.msk.bf16.mxu0 %vm1422_vm1, %v1421_v9  ;;  %1194 = vmatprep.mubr.msk.bf16.mxu1 %vm1422_vm1, %v1421_v9 }
 0x16b   : > { %1185 = vmatpush3.bf16.msra.mxu0 %v1277_v28  ;;  %1193 = vmatpush3.bf16.msra.mxu1 %v1278_v29 }
 0x16e   : > { %1187 = vmatmul.mubr.msk.bf16.vlgmr.msra.gmra.mrb[8].mxu0 %vm431_vm0, %v462_v23  ;;  %1195 = vmatmul.mubr.msk.bf16.vlgmr.msra.gmra.mrb[8].mxu1 %vm431_vm0, %v462_v23 }
 0x231   : > { %v523_v32 = vpop.f32.mrb[0].mxu0  ;;  %v586_v33 = vpop.f32.mrb[0].mxu1 }
 0x232   : > { %v524_v34 = vadd.f32 %v1076_v30, %v523_v32  ;;  %v587_v35 = vadd.f32 %v1080_v31, %v586_v33  ;;  %v1156_v36 = vpop.f32.mrb[1].mxu0  ;;  %v1164_v37 = vpop.f32.mrb[1].mxu1 }
 0x233   : > { %v526_v38 = vpop.f32.mrb[2].mxu0  ;;  %v589_v39 = vpop.f32.mrb[2].mxu1 }
 0x234   : > { %v655_v40 = vpack.c.bf16 %v524_v34, %v524_v34  ;;  %v658_v41 = vpack.c.bf16 %v587_v35, %v587_v35  ;;  %v1157_v42 = vpop.f32.mrb[3].mxu0  ;;  %v1165_v43 = vpop.f32.mrb[3].mxu1 }
 0x236   : > { %657 = vst.msk [vmem:[%s407_s28] sm:$0xf] %vm656_vm2, %v655_v40  ;;  %659 = vst.msk [vmem:[%s1622_s12] sm:$0xf] %vm656_vm2, %v658_v41 }
 0x239   : > { %v649_v46 = vpop.f32.mrb[4].mxu0  ;;  %v721_v47 = vpop.f32.mrb[4].mxu1 }
 0x23a   : > { %v650_v48 = vadd.f32 %v1084_v44, %v649_v46  ;;  %v722_v49 = vadd.f32 %v1093_v45, %v721_v47  ;;  %v1172_v50 = vpop.f32.mrb[5].mxu0  ;;  %v1180_v51 = vpop.f32.mrb[5].mxu1 }
 0x23b   : > { %v652_v52 = vpop.f32.mrb[6].mxu0  ;;  %v724_v53 = vpop.f32.mrb[6].mxu1 }
 0x23c   : > { %v660_v54 = vpack.c.bf16 %v650_v48, %v650_v48  ;;  %v857_v55 = vpack.c.bf16 %v722_v49, %v722_v49  ;;  %v1173_v56 = vpop.f32.mrb[7].mxu0  ;;  %v1181_v57 = vpop.f32.mrb[7].mxu1 }
 0x23e   : > { %661 = vst.msk [vmem:[%s1644_s16] sm:$0xf] %vm656_vm2, %v660_v54  ;;  %1115 = vst.msk [vmem:[%s407_s28 + $0x4] sm:$0xf] %vm656_vm2, %v857_v55  ;;  %s1287_s28 = scalar_lea.vmem %s1286_s4, 256 }
 0x23f   : > { %p1289_p2 = scmp.lt.s32.totalorder %s1287_s28, %s1281_s20 }
 0x241   : > { %p1290_p3 = por %p1289_p2, %p1288_p1 }
 0x243   : > { %p1291_p5 = pnand %p1290_p3, %p1284_p0 }
 0x245   : > { %1294 = shalt.err (!%p1291_p5)
}
 0x246   : > { %s1295_s0 = scalar_lea.hbm %s1641_s15, 128  ;;  %s1299_s3 = scalar_lea.hbm %s1796_s9, 256 }
 0x247   : > { %p1296_p6 = scmp.ne.s32.totalorder %s1641_s15, %s1295_s0  ;;  %p1300_p10 = scmp.lt.u32.totalorder %s1641_s15, %s1796_s9 }
 0x248   : > { %p1301_p11 = scmp.lt.u32.totalorder %s1299_s3, %s1295_s0  ;;  %p1303_p13 = scmp.lt.u32.totalorder %s1295_s0, %s1641_s15 }
 0x249   : > { %p1297_p7 = pnand %p1296_p6, %p1530_p4 }
 0x24a   : > { %p1302_p12 = por %p1301_p11, %p1300_p10 }
 0x24b   : > { %p1298_p9 = pneg %p1297_p7 }
 0x24c   : > { %p1304_p0 = por %p1303_p13, %p1302_p12 }
 0x24e   : > { %p1305_p1 = pnand %p1304_p0, %p1298_p9 }
 0x250   : > { %1308 = shalt.err (!%p1305_p1)
}
 0x251   : > { %s1802_s20 = smov 64   ;;  %s1804_s26 = smov 4   ;;  %v786_v60 = vpop.f32.mrb[8].mxu0  ;;  %v851_v61 = vpop.f32.mrb[8].mxu1 }
 0x252   : > { %1198 = dma.vmem_to_hbm [thread:$0]  (%p1530_p4), %s1635_s14, 128, %s1641_s15, %s1657_s23, %s1802_s20, %s1802_s20, %s1804_s26   ;;  %v787_v62 = vadd.f32 %v1102_v58, %v786_v60  ;;  %v852_v63 = vadd.f32 %v1111_v59, %v851_v61  ;;  %v1188_v0 = vpop.f32.mrb[9].mxu0  ;;  %v1196_v1 = vpop.f32.mrb[9].mxu1 }
 0x253   : > { %s908_s28 = sshll.u32 %s1622_s12, 4  ;;  %s1819_s0 = sadd.s32 4294967295, %s1419_s22   ;;  %v789_v2 = vpop.f32.mrb[10].mxu0  ;;  %v854_v3 = vpop.f32.mrb[10].mxu1  ;;  %s1690_s28 = int_to_ptr.vmem [resolvable:$true] %s908_s28 }
 0x254   : > { %s1687_s1 = sand.u32 1, %s1819_s0   ;;  %s925_s2 = sshll.u32 %s1644_s16, 4  ;;  %v860_v4 = vpack.c.bf16 %v787_v62, %v787_v62  ;;  %v863_v5 = vpack.c.bf16 %v852_v63, %v852_v63  ;;  %v1189_v6 = vpop.f32.mrb[11].mxu0  ;;  %v1197_v7 = vpop.f32.mrb[11].mxu1  ;;  %s1698_s2 = int_to_ptr.vmem [resolvable:$true] %s925_s2 }
 0x255   : > { %s1696_s23 = scalar_lea.hbm %s1797_s10, %s1633_s13  ;;  %s1704_s4 = scalar_lea.hbm %s1798_s11, %s1633_s13 }
 0x256   : > { %1116 = vst.msk [vmem:[%s1622_s12 + $0x4] sm:$0xf] %vm656_vm2, %v860_v4  ;;  %1117 = vst.msk [vmem:[%s1644_s16 + $0x4] sm:$0xf] %vm656_vm2, %v863_v5  ;;  %s872_s0 = scalar_lea.sflag [#allocation5], %s1687_s1  ;;  %s1309_s20 = scalar_lea.vmem %s1690_s28, 128 }
 0x257   : > { %p1310_p2 = scmp.ne.s32.totalorder %s1690_s28, %s1309_s20  ;;  %s1426_s14 = smov [#allocation4]  }
 0x258   : > { %s1313_s15 = sshll.u32 %s1426_s14, 4  ;;  %s1314_s15 = int_to_ptr.vmem [resolvable:$false] %s1313_s15 }
 0x259   : > { %p1311_p3 = pnand %p1310_p2, %p1530_p4  ;;  %s1315_s26 = scalar_lea.vmem %s1314_s15, 256 }
 0x25a   : > { %p1316_p6 = scmp.lt.s32.totalorder %s1690_s28, %s1314_s15  ;;  %p1317_p7 = scmp.lt.s32.totalorder %s1315_s26, %s1309_s20 }
 0x25b   : > { %p1312_p5 = pneg %p1311_p3 }
 0x25c   : > { %p1318_p9 = por %p1317_p7, %p1316_p6 }
 0x25e   : > { %p1319_p10 = pnand %p1318_p9, %p1312_p5 }
 0x260   : > { %1322 = shalt.err (!%p1319_p10)
}
 0x261   : > { %s1323_s13 = scalar_lea.hbm %s1696_s23, 128  ;;  %s1327_s3 = scalar_lea.hbm %s1797_s10, 256 }
 0x262   : > { %p1324_p11 = scmp.ne.s32.totalorder %s1696_s23, %s1323_s13  ;;  %p1328_p0 = scmp.lt.u32.totalorder %s1696_s23, %s1797_s10 }
 0x263   : > { %p1329_p1 = scmp.lt.u32.totalorder %s1327_s3, %s1323_s13  ;;  %p1331_p3 = scmp.lt.u32.totalorder %s1323_s13, %s1696_s23 }
 0x264   : > { %p1325_p12 = pnand %p1324_p11, %p1530_p4 }
 0x265   : > { %p1330_p2 = por %p1329_p1, %p1328_p0 }
 0x266   : > { %p1326_p13 = pneg %p1325_p12 }
 0x267   : > { %p1332_p5 = por %p1331_p3, %p1330_p2 }
 0x269   : > { %p1333_p6 = pnand %p1332_p5, %p1326_p13 }
 0x26b   : > { %1336 = shalt.err (!%p1333_p6)
}
 0x26c   : > { %s1820_s20 = smov 4   ;;  %s1821_s26 = smov 64  }
 0x26d   : > { %1199 = dma.vmem_to_hbm [thread:$0]  (%p1530_p4), %s1690_s28, 128, %s1696_s23, %s872_s0, %s1821_s26, %s1821_s26, %s1820_s20  }
 0x26e   : > { %s1337_s15 = scalar_lea.vmem %s1698_s2, 128  ;;  %s1427_s13 = smov [#allocation6]  }
 0x26f   : > { %p1338_p7 = scmp.ne.s32.totalorder %s1698_s2, %s1337_s15  ;;  %s1341_s12 = sshll.u32 %s1427_s13, 4  ;;  %s1342_s12 = int_to_ptr.vmem [resolvable:$false] %s1341_s12 }
 0x270   : > { %s1343_s16 = scalar_lea.vmem %s1342_s12, 256  ;;  %p1344_p11 = scmp.lt.s32.totalorder %s1698_s2, %s1342_s12 }
 0x271   : > { %p1339_p9 = pnand %p1338_p7, %p1530_p4  ;;  %p1345_p12 = scmp.lt.s32.totalorder %s1343_s16, %s1337_s15 }
 0x273   : > { %p1340_p10 = pneg %p1339_p9  ;;  %p1346_p13 = por %p1345_p12, %p1344_p11 }
 0x275   : > { %p1347_p0 = pnand %p1346_p13, %p1340_p10 }
 0x277   : > { %1350 = shalt.err (!%p1347_p0)
}
 0x278   : > { %s1351_s28 = scalar_lea.hbm %s1704_s4, 128  ;;  %s1355_s24 = scalar_lea.hbm %s1798_s11, 256 }
 0x279   : > { %p1352_p1 = scmp.ne.s32.totalorder %s1704_s4, %s1351_s28  ;;  %p1356_p5 = scmp.lt.u32.totalorder %s1704_s4, %s1798_s11 }
 0x27a   : > { %p1357_p6 = scmp.lt.u32.totalorder %s1355_s24, %s1351_s28  ;;  %p1359_p9 = scmp.lt.u32.totalorder %s1351_s28, %s1704_s4 }
 0x27b   : > { %p1353_p2 = pnand %p1352_p1, %p1530_p4 }
 0x27c   : > { %p1358_p7 = por %p1357_p6, %p1356_p5 }
 0x27d   : > { %p1354_p3 = pneg %p1353_p2 }
 0x27e   : > { %p1360_p10 = por %p1359_p9, %p1358_p7 }
 0x280   : > { %p1361_p11 = pnand %p1360_p10, %p1354_p3 }
 0x282   : > { %1364 = shalt.err (!%p1361_p11)
}
 0x283   : > { %1200 = dma.vmem_to_hbm [thread:$0]  (%p1530_p4), %s1698_s2, 128, %s1704_s4, %s872_s0, %s1821_s26, %s1821_s26, %s1820_s20  }
 0x284 PF: > { %p1214_p12 = scmp.ge.s32.totalorder %s1419_s22, 2  ;;  %s940_s15 = sand.u32 1, %s1399_s17  }
 0x285   : > { %s941_s12 = scalar_lea.sflag [#allocation3], %s940_s15 }
 0x286   : > { %p1205_p13 = pnand %p1214_p12, %p1539_p8 }
 0x288   : > { %1390 = dma.done.wait (!%p1205_p13), %s941_s12, 128  }
 0x289   : > { %1392 = vsyncadd (!%p1205_p13), %s941_s12, 4294967168  ;;  %s1822_s27 = sadd.s32 4294967294, %s1419_s22  }
 0x28a   : > { %s949_s16 = sand.u32 1, %s1822_s27  }
 0x28b   : > { %s950_s28 = scalar_lea.sflag [#allocation5], %s949_s16 }
 0x28c   : > { %1394 = dma.done.wait (!%p1205_p13), %s950_s28, 256  }
 0x28d   : > { %1396 = vsyncadd (!%p1205_p13), %s950_s28, 4294967040  ;;  %s28_s22 = sadd.s32 1, %s1419_s22   ;;  %s1823_s17 = smov %s1403_s18 }
 0x28e   : > { %p25_p4 = scmp.ge.s32.totalorder %s28_s22, 4   ;;  %s1824_s18 = smov %s1407_s19 }
 0x28f   : > { %s1825_s19 = smov %s1545_s30  ;;  %s1826_s20 = smov %s1415_s21 }
 0x290   : > { %s1827_s21 = smov %s1829_s25  ;;  %27 = sbr.rel (!%p25_p4) target bundleno = 12 (0xc), region = 132 }
 0x297   :  { %964 = vsyncpa [#allocation3], 1 }
 0x298   :  { %966 = vsyncpa [#allocation3 + $0x1], 1 }
 0x299   :  { %967 = vsyncpa [#allocation5], 1 }
 0x29a   :  { %969 = vsyncpa [#allocation5 + $0x1], 1 }

</bundles_post_ra>
